<compile_context>
chip_gen: v5e
topology: v5e:2x2
jax: 0.10.0
libtpu: 0.0.40
codegen_flags: <defaults>
</compile_context>

<pallas_src>
import functools
import math

import jax
import jax.numpy as jnp
import numpy as np
from jax import lax
from jax.experimental import pallas as pl
from jax.experimental.pallas import tpu as pltpu

# ---------------- model hyper-parameters (small, deterministic) --------------
B = 2          # batch
S = 16         # sequence length
D_MODEL = 32   # d_model
NUM_HEADS = 4
HEAD_DIM = D_MODEL // NUM_HEADS
D_FF = 64
CHUNKS = 2     # ChunkFeedForward chunks (math-equivalent to no chunking)
CAUSAL = False
LN_EPS = 1e-5  # torch.nn.LayerNorm default
N_TOK = B * S  # batch folded into the token axis inside the kernel


# ----------------------------- Pallas kernel ----------------------------------
def _ln(x, g, b):
    mu = jnp.mean(x, axis=-1, keepdims=True)
    var = jnp.mean((x - mu) ** 2, axis=-1, keepdims=True)
    return (x - mu) * lax.rsqrt(var + LN_EPS) * g + b


def reformer_layer_kernel(x1_ref, x2_ref, mask_ref,
                          wqkv_ref, bqkv_ref, wo_ref, bo_ref,
                          lnf_g_ref, lnf_b_ref,
                          w1_ref, b1_ref, w2_ref, b2_ref,
                          lng_g_ref, lng_b_ref,
                          y1_ref, y2_ref,
                          *, num_heads, head_dim):
    """Whole (B*S, D) problem in a single grid step; writes y1 and y2."""
    x1 = x1_ref[...]                      # (N, D), N = B*S
    x2 = x2_ref[...]                      # (N, D)
    n_tok, d_model = x1.shape

    # ---------------- f block: y1 = x1 + LN(MHA(x2)) ----------------
    # Projections computed directly in transposed (D, N) orientation so the head
    # split below is a free tile-aligned reshape (no lane slicing, no transposes).
    def proj_t(idx):                      # -> (H, Dh, N)
        t = lax.dot_general(wqkv_ref[idx], x2,
                            dimension_numbers=(((0,), (1,)), ((), ())),
                            preferred_element_type=jnp.float32)      # (D, N)
        return (t + bqkv_ref[idx]).reshape(num_heads, head_dim, n_tok)

    qh = proj_t(0)                        # already scaled by 1/sqrt(Dh) host-side
    kh = proj_t(1)
    vh = proj_t(2)

    # Head-batched scores over all B*S tokens; the additive mask keeps attention
    # block-diagonal per batch element (and causal if requested).
    scores = lax.dot_general(qh, kh,
                             dimension_numbers=(((1,), (1,)), ((0,), (0,))),
                             preferred_element_type=jnp.float32)     # (H, N, N)
    scores = scores + mask_ref[...]                                  # bcast over H

    m = jnp.max(scores, axis=-1, keepdims=True)
    e = jnp.exp(scores - m)
    denom = jnp.sum(e, axis=-1, keepdims=True)
    # approx=True moves this onto the EUP at production sizes; exact here for parity.
    probs = e * pl.reciprocal(denom, approx=False)                   # (H, N, N)

    ctx_t = lax.dot_general(vh, probs,
                            dimension_numbers=(((2,), (2,)), ((0,), (0,))),
                            preferred_element_type=jnp.float32)      # (H, Dh, N)
    ctx_t = ctx_t.reshape(d_model, n_tok)                            # free head merge

    # Single output projection over the merged head dim (K = d_model).
    attn = lax.dot_general(ctx_t, wo_ref[...],
                           dimension_numbers=(((0,), (0,)), ((), ())),
                           preferred_element_type=jnp.float32) + bo_ref[...]   # (N, D)
    y1_ref[...] = (x1 + _ln(attn, lnf_g_ref[...], lnf_b_ref[...])).astype(y1_ref.dtype)

    # ---------------- g block: y2 = x2 + LN(FFN(x1)) ----------------
    h = jnp.dot(x1, w1_ref[...], preferred_element_type=jnp.float32) + b1_ref[...]
    h = jnp.maximum(h, 0.0)                                          # ReLU
    f = jnp.dot(h, w2_ref[...], preferred_element_type=jnp.float32) + b2_ref[...]
    y2_ref[...] = (x2 + _ln(f, lng_g_ref[...], lng_b_ref[...])).astype(y2_ref.dtype)


# ------------------------------- wrappers --------------------------------------
def _full_spec(shape):
    nd = len(shape)
    return pl.BlockSpec(shape, lambda i: (0,) * nd)


def _pack_params(p):
    """One-time host-side parameter packing (scale folded into Q weights/bias)."""
    inv = 1.0 / math.sqrt(HEAD_DIM)
    wqkv = jnp.stack([p["wq"] * inv, p["wk"], p["wv"]])              # (3, D, D)
    bqkv = jnp.stack([(p["bq"] * inv).reshape(D_MODEL, 1),
                      p["bk"].reshape(D_MODEL, 1),
                      p["bv"].reshape(D_MODEL, 1)])                  # (3, D, 1)
    return wqkv, bqkv


def _attention_mask():
    """Additive mask: block-diagonal per batch element (+ causal if enabled)."""
    n = np.arange(N_TOK)
    keep = (n[:, None] // S) == (n[None, :] // S)
    if CAUSAL:
        keep = keep & (n[None, :] <= n[:, None])
    return jnp.asarray(np.where(keep, 0.0, -1e30), jnp.float32)      # (N, N)


def reformer_layer_forward(x1, x2, params):
    """Runs the full ReformerLayer forward as a single fused, single-step kernel."""
    p = params
    wqkv, bqkv = _pack_params(p)
    mask = _attention_mask()

    x1f = x1.reshape(N_TOK, D_MODEL)      # free metadata reshape (fold batch)
    x2f = x2.reshape(N_TOK, D_MODEL)

    kernel = functools.partial(reformer_layer_kernel,
                               num_heads=NUM_HEADS, head_dim=HEAD_DIM)

    args = (x1f, x2f, mask, wqkv, bqkv, p["wo"], p["bo"],
            p["ln_f_g"], p["ln_f_b"],
            p["w1"], p["b1"], p["w2"], p["b2"],
            p["ln_g_g"], p["ln_g_b"])

    y1f, y2f = pl.pallas_call(
        kernel,
        out_shape=(jax.ShapeDtypeStruct((N_TOK, D_MODEL), x1.dtype),
                   jax.ShapeDtypeStruct((N_TOK, D_MODEL), x2.dtype)),
        grid_spec=pltpu.PrefetchScalarGridSpec(
            num_scalar_prefetch=0,
            grid=(1,),                                  # single step, all resident
            in_specs=[_full_spec(a.shape) for a in args],
            out_specs=[_full_spec((N_TOK, D_MODEL)),
                       _full_spec((N_TOK, D_MODEL))],
        ),
        compiler_params=pltpu.CompilerParams(dimension_semantics=("arbitrary",)),
    )(*args)

    return y1f.reshape(B, S, D_MODEL), y2f.reshape(B, S, D_MODEL)


# ---------------------------- pure-JAX reference --------------------------------
def _layernorm(x, g, b):
    mu = jnp.mean(x, axis=-1, keepdims=True)
    var = jnp.mean((x - mu) ** 2, axis=-1, keepdims=True)
    return (x - mu) * lax.rsqrt(var + LN_EPS) * g + b


def reference_forward(x1, x2, p):
    def mha(x):
        q = x @ p["wq"] + p["bq"]
        k = x @ p["wk"] + p["bk"]
        v = x @ p["wv"] + p["bv"]
        q = q.reshape(B, S, NUM_HEADS, HEAD_DIM)
        k = k.reshape(B, S, NUM_HEADS, HEAD_DIM)
        v = v.reshape(B, S, NUM_HEADS, HEAD_DIM)
        s = jnp.einsum("bqhd,bkhd->bhqk", q, k) / math.sqrt(HEAD_DIM)
        if CAUSAL:
            mask = jnp.tril(jnp.ones((S, S), bool))
            s = jnp.where(mask, s, -1e30)
        a = jax.nn.softmax(s, axis=-1)
        ctx = jnp.einsum("bhqk,bkhd->bqhd", a, v).reshape(B, S, D_MODEL)
        return ctx @ p["wo"] + p["bo"]

    def ffn(x):
        return jnp.maximum(x @ p["w1"] + p["b1"], 0.0) @ p["w2"] + p["b2"]

    y1 = x1 + _layernorm(mha(x2), p["ln_f_g"], p["ln_f_b"])
    y2 = x2 + _layernorm(ffn(x1), p["ln_g_g"], p["ln_g_b"])
    return y1, y2


# ---------------------------------- main -----------------------------------------
def init_params(key):
    ks = jax.random.split(key, 8)
    scale = 0.05

    def lin(k, fan_in, fan_out):
        return scale * jax.random.normal(k, (fan_in, fan_out), jnp.float32)

    return {
        "wq": lin(ks[0], D_MODEL, D_MODEL), "bq": jnp.zeros((1, D_MODEL), jnp.float32),
        "wk": lin(ks[1], D_MODEL, D_MODEL), "bk": jnp.zeros((1, D_MODEL), jnp.float32),
        "wv": lin(ks[2], D_MODEL, D_MODEL), "bv": jnp.zeros((1, D_MODEL), jnp.float32),
        "wo": lin(ks[3], D_MODEL, D_MODEL), "bo": jnp.zeros((1, D_MODEL), jnp.float32),
        "w1": lin(ks[4], D_MODEL, D_FF),    "b1": 0.01 * jnp.ones((1, D_FF), jnp.float32),
        "w2": lin(ks[5], D_FF, D_MODEL),    "b2": 0.01 * jnp.ones((1, D_MODEL), jnp.float32),
        "ln_f_g": jnp.ones((1, D_MODEL), jnp.float32),
        "ln_f_b": jnp.zeros((1, D_MODEL), jnp.float32),
        "ln_g_g": jnp.ones((1, D_MODEL), jnp.float32),
        "ln_g_b": jnp.zeros((1, D_MODEL), jnp.float32),
    }


if __name__ == "__main__":
    key = jax.random.PRNGKey(0)
    k1, k2, kp = jax.random.split(key, 3)
    x1 = jax.random.normal(k1, (B, S, D_MODEL), jnp.float32)
    x2 = jax.random.normal(k2, (B, S, D_MODEL), jnp.float32)
    params = init_params(kp)

    y1, y2 = reformer_layer_forward(x1, x2, params)
    y1 = jax.block_until_ready(y1)
    y2 = jax.block_until_ready(y2)

    r1, r2 = reference_forward(x1, x2, params)
    np.testing.assert_allclose(np.asarray(y1), np.asarray(r1), atol=1e-4, rtol=1e-4)
    np.testing.assert_allclose(np.asarray(y2), np.asarray(r2), atol=1e-4, rtol=1e-4)

    print("KERNEL_OK")
</pallas_src>

<mosaic_0001>
module attributes {stable_mosaic.version = 11 : i64} {
  func.func @reformer_layer_kernel(%arg0: i32, %arg1: memref<32x32xf32, #tpu.memory_space<vmem>>, %arg2: memref<32x32xf32, #tpu.memory_space<vmem>>, %arg3: memref<32x32xf32, #tpu.memory_space<vmem>>, %arg4: memref<3x32x32xf32, #tpu.memory_space<vmem>>, %arg5: memref<3x32x1xf32, #tpu.memory_space<vmem>>, %arg6: memref<32x32xf32, #tpu.memory_space<vmem>>, %arg7: memref<1x32xf32, #tpu.memory_space<vmem>>, %arg8: memref<1x32xf32, #tpu.memory_space<vmem>>, %arg9: memref<1x32xf32, #tpu.memory_space<vmem>>, %arg10: memref<32x64xf32, #tpu.memory_space<vmem>>, %arg11: memref<1x64xf32, #tpu.memory_space<vmem>>, %arg12: memref<64x32xf32, #tpu.memory_space<vmem>>, %arg13: memref<1x32xf32, #tpu.memory_space<vmem>>, %arg14: memref<1x32xf32, #tpu.memory_space<vmem>>, %arg15: memref<1x32xf32, #tpu.memory_space<vmem>>, %arg16: memref<32x32xf32, #tpu.memory_space<vmem>>, %arg17: memref<32x32xf32, #tpu.memory_space<vmem>>) attributes {dimension_semantics = [#tpu.dimension_semantics<arbitrary>], iteration_bounds = array<i64: 1>, scalar_prefetch = 0 : i64, scratch_operands = 0 : i64, tpu.core_type = #tpu.core_type<tc>, window_params = [{pipeline_mode = #tpu.pipeline_mode<synchronous>, transform_indices = @transform_0, window_bounds = array<i64: 32, 32>}, {pipeline_mode = #tpu.pipeline_mode<synchronous>, transform_indices = @transform_1, window_bounds = array<i64: 32, 32>}, {pipeline_mode = #tpu.pipeline_mode<synchronous>, transform_indices = @transform_2, window_bounds = array<i64: 32, 32>}, {pipeline_mode = #tpu.pipeline_mode<synchronous>, transform_indices = @transform_3, window_bounds = array<i64: 3, 32, 32>}, {pipeline_mode = #tpu.pipeline_mode<synchronous>, transform_indices = @transform_4, window_bounds = array<i64: 3, 32, 1>}, {pipeline_mode = #tpu.pipeline_mode<synchronous>, transform_indices = @transform_5, window_bounds = array<i64: 32, 32>}, {pipeline_mode = #tpu.pipeline_mode<synchronous>, transform_indices = @transform_6, window_bounds = array<i64: 1, 32>}, {pipeline_mode = #tpu.pipeline_mode<synchronous>, transform_indices = @transform_7, window_bounds = array<i64: 1, 32>}, {pipeline_mode = #tpu.pipeline_mode<synchronous>, transform_indices = @transform_8, window_bounds = array<i64: 1, 32>}, {pipeline_mode = #tpu.pipeline_mode<synchronous>, transform_indices = @transform_9, window_bounds = array<i64: 32, 64>}, {pipeline_mode = #tpu.pipeline_mode<synchronous>, transform_indices = @transform_10, window_bounds = array<i64: 1, 64>}, {pipeline_mode = #tpu.pipeline_mode<synchronous>, transform_indices = @transform_11, window_bounds = array<i64: 64, 32>}, {pipeline_mode = #tpu.pipeline_mode<synchronous>, transform_indices = @transform_12, window_bounds = array<i64: 1, 32>}, {pipeline_mode = #tpu.pipeline_mode<synchronous>, transform_indices = @transform_13, window_bounds = array<i64: 1, 32>}, {pipeline_mode = #tpu.pipeline_mode<synchronous>, transform_indices = @transform_14, window_bounds = array<i64: 1, 32>}, {pipeline_mode = #tpu.pipeline_mode<synchronous>, transform_indices = @transform_15, window_bounds = array<i64: 32, 32>}, {pipeline_mode = #tpu.pipeline_mode<synchronous>, transform_indices = @transform_16, window_bounds = array<i64: 32, 32>}]} {
    %c0 = arith.constant 0 : index
    %c0_0 = arith.constant 0 : index
    %0 = vector.load %arg1[%c0, %c0_0] : memref<32x32xf32, #tpu.memory_space<vmem>>, vector<32x32xf32>
    %c0_1 = arith.constant 0 : index
    %c0_2 = arith.constant 0 : index
    %1 = vector.load %arg2[%c0_1, %c0_2] : memref<32x32xf32, #tpu.memory_space<vmem>>, vector<32x32xf32>
    %c0_3 = arith.constant 0 : index
    %c0_4 = arith.constant 0 : index
    %c0_5 = arith.constant 0 : index
    %2 = vector.load %arg4[%c0_3, %c0_4, %c0_5] : memref<3x32x32xf32, #tpu.memory_space<vmem>>, vector<1x32x32xf32>
    %3 = vector.shape_cast %2 : vector<1x32x32xf32> to vector<32x32xf32>
    %cst = arith.constant dense<0.000000e+00> : vector<32x32xf32>
    %4 = tpu.matmul %3, %1, %cst {dimension_numbers = #tpu.dot_dimension_numbers<[0], [1], [1], [0], [0, 1, 1, 0], [], []>} : vector<32x32xf32>, vector<32x32xf32>, vector<32x32xf32> -> vector<32x32xf32>
    %c0_6 = arith.constant 0 : index
    %c0_7 = arith.constant 0 : index
    %c0_8 = arith.constant 0 : index
    %5 = vector.load %arg5[%c0_6, %c0_7, %c0_8] : memref<3x32x1xf32, #tpu.memory_space<vmem>>, vector<1x32x1xf32>
    %6 = vector.shape_cast %5 : vector<1x32x1xf32> to vector<32x1xf32>
    %7 = vector.broadcast %6 : vector<32x1xf32> to vector<32x32xf32>
    %8 = arith.addf %4, %7 : vector<32x32xf32>
    %9 = vector.shape_cast %8 : vector<32x32xf32> to vector<4x8x32xf32>
    %c1 = arith.constant 1 : index
    %c0_9 = arith.constant 0 : index
    %c0_10 = arith.constant 0 : index
    %10 = vector.load %arg4[%c1, %c0_9, %c0_10] : memref<3x32x32xf32, #tpu.memory_space<vmem>>, vector<1x32x32xf32>
    %11 = vector.shape_cast %10 : vector<1x32x32xf32> to vector<32x32xf32>
    %cst_11 = arith.constant dense<0.000000e+00> : vector<32x32xf32>
    %12 = tpu.matmul %11, %1, %cst_11 {dimension_numbers = #tpu.dot_dimension_numbers<[0], [1], [1], [0], [0, 1, 1, 0], [], []>} : vector<32x32xf32>, vector<32x32xf32>, vector<32x32xf32> -> vector<32x32xf32>
    %c1_12 = arith.constant 1 : index
    %c0_13 = arith.constant 0 : index
    %c0_14 = arith.constant 0 : index
    %13 = vector.load %arg5[%c1_12, %c0_13, %c0_14] : memref<3x32x1xf32, #tpu.memory_space<vmem>>, vector<1x32x1xf32>
    %14 = vector.shape_cast %13 : vector<1x32x1xf32> to vector<32x1xf32>
    %15 = vector.broadcast %14 : vector<32x1xf32> to vector<32x32xf32>
    %16 = arith.addf %12, %15 : vector<32x32xf32>
    %17 = vector.shape_cast %16 : vector<32x32xf32> to vector<4x8x32xf32>
    %c2 = arith.constant 2 : index
    %c0_15 = arith.constant 0 : index
    %c0_16 = arith.constant 0 : index
    %18 = vector.load %arg4[%c2, %c0_15, %c0_16] : memref<3x32x32xf32, #tpu.memory_space<vmem>>, vector<1x32x32xf32>
    %19 = vector.shape_cast %18 : vector<1x32x32xf32> to vector<32x32xf32>
    %cst_17 = arith.constant dense<0.000000e+00> : vector<32x32xf32>
    %20 = tpu.matmul %19, %1, %cst_17 {dimension_numbers = #tpu.dot_dimension_numbers<[0], [1], [1], [0], [0, 1, 1, 0], [], []>} : vector<32x32xf32>, vector<32x32xf32>, vector<32x32xf32> -> vector<32x32xf32>
    %c2_18 = arith.constant 2 : index
    %c0_19 = arith.constant 0 : index
    %c0_20 = arith.constant 0 : index
    %21 = vector.load %arg5[%c2_18, %c0_19, %c0_20] : memref<3x32x1xf32, #tpu.memory_space<vmem>>, vector<1x32x1xf32>
    %22 = vector.shape_cast %21 : vector<1x32x1xf32> to vector<32x1xf32>
    %23 = vector.broadcast %22 : vector<32x1xf32> to vector<32x32xf32>
    %24 = arith.addf %20, %23 : vector<32x32xf32>
    %25 = vector.shape_cast %24 : vector<32x32xf32> to vector<4x8x32xf32>
    %cst_21 = arith.constant dense<0.000000e+00> : vector<4x32x32xf32>
    %26 = tpu.matmul %9, %17, %cst_21 {dimension_numbers = #tpu.dot_dimension_numbers<[1], [1], [2], [2], [0, 0, 0, 2, 1, 2], [0], [0]>} : vector<4x8x32xf32>, vector<4x8x32xf32>, vector<4x32x32xf32> -> vector<4x32x32xf32>
    %c0_22 = arith.constant 0 : index
    %c0_23 = arith.constant 0 : index
    %27 = vector.load %arg3[%c0_22, %c0_23] : memref<32x32xf32, #tpu.memory_space<vmem>>, vector<32x32xf32>
    %28 = vector.shape_cast %27 : vector<32x32xf32> to vector<1x32x32xf32>
    %29 = vector.broadcast %28 : vector<1x32x32xf32> to vector<4x32x32xf32>
    %30 = arith.addf %26, %29 : vector<4x32x32xf32>
    %cst_24 = arith.constant dense<0xFF800000> : vector<4x32xf32>
    %31 = vector.multi_reduction <maximumf>, %30, %cst_24 [2] : vector<4x32x32xf32> to vector<4x32xf32>
    %32 = vector.shape_cast %31 : vector<4x32xf32> to vector<4x32x1xf32>
    %33 = vector.broadcast %32 : vector<4x32x1xf32> to vector<4x32x32xf32>
    %34 = arith.subf %30, %33 : vector<4x32x32xf32>
    %35 = math.exp %34 : vector<4x32x32xf32>
    %cst_25 = arith.constant dense<0.000000e+00> : vector<4x32xf32>
    %36 = vector.multi_reduction <add>, %35, %cst_25 [2] : vector<4x32x32xf32> to vector<4x32xf32>
    %37 = vector.shape_cast %36 : vector<4x32xf32> to vector<4x32x1xf32>
    %38 = tpu.reciprocal %37 : vector<4x32x1xf32> -> vector<4x32x1xf32>
    %39 = vector.broadcast %38 : vector<4x32x1xf32> to vector<4x32x32xf32>
    %40 = arith.mulf %35, %39 : vector<4x32x32xf32>
    %cst_26 = arith.constant dense<0.000000e+00> : vector<4x8x32xf32>
    %41 = tpu.matmul %25, %40, %cst_26 {dimension_numbers = #tpu.dot_dimension_numbers<[2], [2], [1], [1], [0, 0, 0, 1, 1, 1], [0], [0]>} : vector<4x8x32xf32>, vector<4x32x32xf32>, vector<4x8x32xf32> -> vector<4x8x32xf32>
    %42 = vector.shape_cast %41 : vector<4x8x32xf32> to vector<32x32xf32>
    %c0_27 = arith.constant 0 : index
    %c0_28 = arith.constant 0 : index
    %43 = vector.load %arg6[%c0_27, %c0_28] : memref<32x32xf32, #tpu.memory_space<vmem>>, vector<32x32xf32>
    %cst_29 = arith.constant dense<0.000000e+00> : vector<32x32xf32>
    %44 = tpu.matmul %42, %43, %cst_29 {dimension_numbers = #tpu.dot_dimension_numbers<[0], [0], [1], [1], [0, 1, 1, 1], [], []>} : vector<32x32xf32>, vector<32x32xf32>, vector<32x32xf32> -> vector<32x32xf32>
    %c0_30 = arith.constant 0 : index
    %c0_31 = arith.constant 0 : index
    %45 = vector.load %arg7[%c0_30, %c0_31] : memref<1x32xf32, #tpu.memory_space<vmem>>, vector<1x32xf32>
    %46 = vector.broadcast %45 : vector<1x32xf32> to vector<32x32xf32>
    %47 = arith.addf %44, %46 : vector<32x32xf32>
    %c0_32 = arith.constant 0 : index
    %c0_33 = arith.constant 0 : index
    %48 = vector.load %arg8[%c0_32, %c0_33] : memref<1x32xf32, #tpu.memory_space<vmem>>, vector<1x32xf32>
    %c0_34 = arith.constant 0 : index
    %c0_35 = arith.constant 0 : index
    %49 = vector.load %arg9[%c0_34, %c0_35] : memref<1x32xf32, #tpu.memory_space<vmem>>, vector<1x32xf32>
    %cst_36 = arith.constant dense<0.000000e+00> : vector<32xf32>
    %50 = vector.multi_reduction <add>, %47, %cst_36 [1] : vector<32x32xf32> to vector<32xf32>
    %51 = vector.shape_cast %50 : vector<32xf32> to vector<32x1xf32>
    %cst_37 = arith.constant 3.200000e+01 : f32
    %52 = vector.broadcast %cst_37 : f32 to vector<32x1xf32>
    %53 = arith.divf %51, %52 : vector<32x1xf32>
    %54 = vector.broadcast %53 : vector<32x1xf32> to vector<32x32xf32>
    %55 = arith.subf %47, %54 : vector<32x32xf32>
    %56 = arith.mulf %55, %55 : vector<32x32xf32>
    %cst_38 = arith.constant dense<0.000000e+00> : vector<32xf32>
    %57 = vector.multi_reduction <add>, %56, %cst_38 [1] : vector<32x32xf32> to vector<32xf32>
    %58 = vector.shape_cast %57 : vector<32xf32> to vector<32x1xf32>
    %cst_39 = arith.constant 3.200000e+01 : f32
    %59 = vector.broadcast %cst_39 : f32 to vector<32x1xf32>
    %60 = arith.divf %58, %59 : vector<32x1xf32>
    %61 = vector.broadcast %53 : vector<32x1xf32> to vector<32x32xf32>
    %62 = arith.subf %47, %61 : vector<32x32xf32>
    %cst_40 = arith.constant 9.99999974E-6 : f32
    %63 = vector.broadcast %cst_40 : f32 to vector<32x1xf32>
    %64 = arith.addf %60, %63 : vector<32x1xf32>
    %65 = math.rsqrt %64 : vector<32x1xf32>
    %66 = vector.broadcast %65 : vector<32x1xf32> to vector<32x32xf32>
    %67 = arith.mulf %62, %66 : vector<32x32xf32>
    %68 = vector.broadcast %48 : vector<1x32xf32> to vector<32x32xf32>
    %69 = arith.mulf %67, %68 : vector<32x32xf32>
    %70 = vector.broadcast %49 : vector<1x32xf32> to vector<32x32xf32>
    %71 = arith.addf %69, %70 : vector<32x32xf32>
    %72 = arith.addf %0, %71 : vector<32x32xf32>
    %c0_41 = arith.constant 0 : index
    %c0_42 = arith.constant 0 : index
    %73 = vector.load %arg16[%c0_41, %c0_42] : memref<32x32xf32, #tpu.memory_space<vmem>>, vector<32x32xf32>
    tpu.vector_store %arg16[%c0_41, %c0_42], %72 {strides = array<i32>} : memref<32x32xf32, #tpu.memory_space<vmem>>, vector<32x32xf32>,
    %c0_43 = arith.constant 0 : index
    %c0_44 = arith.constant 0 : index
    %74 = vector.load %arg10[%c0_43, %c0_44] : memref<32x64xf32, #tpu.memory_space<vmem>>, vector<32x64xf32>
    %cst_45 = arith.constant dense<0.000000e+00> : vector<32x64xf32>
    %75 = tpu.matmul %0, %74, %cst_45 {dimension_numbers = #tpu.dot_dimension_numbers<[1], [0], [0], [1], [0, 0, 1, 1], [], []>} : vector<32x32xf32>, vector<32x64xf32>, vector<32x64xf32> -> vector<32x64xf32>
    %c0_46 = arith.constant 0 : index
    %c0_47 = arith.constant 0 : index
    %76 = vector.load %arg11[%c0_46, %c0_47] : memref<1x64xf32, #tpu.memory_space<vmem>>, vector<1x64xf32>
    %77 = vector.broadcast %76 : vector<1x64xf32> to vector<32x64xf32>
    %78 = arith.addf %75, %77 : vector<32x64xf32>
    %cst_48 = arith.constant 0.000000e+00 : f32
    %79 = vector.broadcast %cst_48 : f32 to vector<32x64xf32>
    %80 = arith.maximumf %78, %79 : vector<32x64xf32>
    %c0_49 = arith.constant 0 : index
    %c0_50 = arith.constant 0 : index
    %81 = vector.load %arg12[%c0_49, %c0_50] : memref<64x32xf32, #tpu.memory_space<vmem>>, vector<64x32xf32>
    %cst_51 = arith.constant dense<0.000000e+00> : vector<32x32xf32>
    %82 = tpu.matmul %80, %81, %cst_51 {dimension_numbers = #tpu.dot_dimension_numbers<[1], [0], [0], [1], [0, 0, 1, 1], [], []>} : vector<32x64xf32>, vector<64x32xf32>, vector<32x32xf32> -> vector<32x32xf32>
    %c0_52 = arith.constant 0 : index
    %c0_53 = arith.constant 0 : index
    %83 = vector.load %arg13[%c0_52, %c0_53] : memref<1x32xf32, #tpu.memory_space<vmem>>, vector<1x32xf32>
    %84 = vector.broadcast %83 : vector<1x32xf32> to vector<32x32xf32>
    %85 = arith.addf %82, %84 : vector<32x32xf32>
    %c0_54 = arith.constant 0 : index
    %c0_55 = arith.constant 0 : index
    %86 = vector.load %arg14[%c0_54, %c0_55] : memref<1x32xf32, #tpu.memory_space<vmem>>, vector<1x32xf32>
    %c0_56 = arith.constant 0 : index
    %c0_57 = arith.constant 0 : index
    %87 = vector.load %arg15[%c0_56, %c0_57] : memref<1x32xf32, #tpu.memory_space<vmem>>, vector<1x32xf32>
    %cst_58 = arith.constant dense<0.000000e+00> : vector<32xf32>
    %88 = vector.multi_reduction <add>, %85, %cst_58 [1] : vector<32x32xf32> to vector<32xf32>
    %89 = vector.shape_cast %88 : vector<32xf32> to vector<32x1xf32>
    %cst_59 = arith.constant 3.200000e+01 : f32
    %90 = vector.broadcast %cst_59 : f32 to vector<32x1xf32>
    %91 = arith.divf %89, %90 : vector<32x1xf32>
    %92 = vector.broadcast %91 : vector<32x1xf32> to vector<32x32xf32>
    %93 = arith.subf %85, %92 : vector<32x32xf32>
    %94 = arith.mulf %93, %93 : vector<32x32xf32>
    %cst_60 = arith.constant dense<0.000000e+00> : vector<32xf32>
    %95 = vector.multi_reduction <add>, %94, %cst_60 [1] : vector<32x32xf32> to vector<32xf32>
    %96 = vector.shape_cast %95 : vector<32xf32> to vector<32x1xf32>
    %cst_61 = arith.constant 3.200000e+01 : f32
    %97 = vector.broadcast %cst_61 : f32 to vector<32x1xf32>
    %98 = arith.divf %96, %97 : vector<32x1xf32>
    %99 = vector.broadcast %91 : vector<32x1xf32> to vector<32x32xf32>
    %100 = arith.subf %85, %99 : vector<32x32xf32>
    %cst_62 = arith.constant 9.99999974E-6 : f32
    %101 = vector.broadcast %cst_62 : f32 to vector<32x1xf32>
    %102 = arith.addf %98, %101 : vector<32x1xf32>
    %103 = math.rsqrt %102 : vector<32x1xf32>
    %104 = vector.broadcast %103 : vector<32x1xf32> to vector<32x32xf32>
    %105 = arith.mulf %100, %104 : vector<32x32xf32>
    %106 = vector.broadcast %86 : vector<1x32xf32> to vector<32x32xf32>
    %107 = arith.mulf %105, %106 : vector<32x32xf32>
    %108 = vector.broadcast %87 : vector<1x32xf32> to vector<32x32xf32>
    %109 = arith.addf %107, %108 : vector<32x32xf32>
    %110 = arith.addf %1, %109 : vector<32x32xf32>
    %c0_63 = arith.constant 0 : index
    %c0_64 = arith.constant 0 : index
    %111 = vector.load %arg17[%c0_63, %c0_64] : memref<32x32xf32, #tpu.memory_space<vmem>>, vector<32x32xf32>
    tpu.vector_store %arg17[%c0_63, %c0_64], %110 {strides = array<i32>} : memref<32x32xf32, #tpu.memory_space<vmem>>, vector<32x32xf32>,
    return
  }
  func.func @transform_0(%arg0: i32) -> (i32, i32) {
    %c0_i32 = arith.constant 0 : i32
    %c0_i32_0 = arith.constant 0 : i32
    %c0_i32_1 = arith.constant 0 : i32
    return %c0_i32, %c0_i32_0 : i32, i32
  }
  func.func @transform_1(%arg0: i32) -> (i32, i32) {
    %c0_i32 = arith.constant 0 : i32
    %c0_i32_0 = arith.constant 0 : i32
    %c0_i32_1 = arith.constant 0 : i32
    return %c0_i32, %c0_i32_0 : i32, i32
  }
  func.func @transform_2(%arg0: i32) -> (i32, i32) {
    %c0_i32 = arith.constant 0 : i32
    %c0_i32_0 = arith.constant 0 : i32
    %c0_i32_1 = arith.constant 0 : i32
    return %c0_i32, %c0_i32_0 : i32, i32
  }
  func.func @transform_3(%arg0: i32) -> (i32, i32, i32) {
    %c0_i32 = arith.constant 0 : i32
    %c0_i32_0 = arith.constant 0 : i32
    %c0_i32_1 = arith.constant 0 : i32
    %c0_i32_2 = arith.constant 0 : i32
    return %c0_i32, %c0_i32_0, %c0_i32_1 : i32, i32, i32
  }
  func.func @transform_4(%arg0: i32) -> (i32, i32, i32) {
    %c0_i32 = arith.constant 0 : i32
    %c0_i32_0 = arith.constant 0 : i32
    %c0_i32_1 = arith.constant 0 : i32
    %c0_i32_2 = arith.constant 0 : i32
    return %c0_i32, %c0_i32_0, %c0_i32_1 : i32, i32, i32
  }
  func.func @transform_5(%arg0: i32) -> (i32, i32) {
    %c0_i32 = arith.constant 0 : i32
    %c0_i32_0 = arith.constant 0 : i32
    %c0_i32_1 = arith.constant 0 : i32
    return %c0_i32, %c0_i32_0 : i32, i32
  }
  func.func @transform_6(%arg0: i32) -> (i32, i32) {
    %c0_i32 = arith.constant 0 : i32
    %c0_i32_0 = arith.constant 0 : i32
    %c0_i32_1 = arith.constant 0 : i32
    return %c0_i32, %c0_i32_0 : i32, i32
  }
  func.func @transform_7(%arg0: i32) -> (i32, i32) {
    %c0_i32 = arith.constant 0 : i32
    %c0_i32_0 = arith.constant 0 : i32
    %c0_i32_1 = arith.constant 0 : i32
    return %c0_i32, %c0_i32_0 : i32, i32
  }
  func.func @transform_8(%arg0: i32) -> (i32, i32) {
    %c0_i32 = arith.constant 0 : i32
    %c0_i32_0 = arith.constant 0 : i32
    %c0_i32_1 = arith.constant 0 : i32
    return %c0_i32, %c0_i32_0 : i32, i32
  }
  func.func @transform_9(%arg0: i32) -> (i32, i32) {
    %c0_i32 = arith.constant 0 : i32
    %c0_i32_0 = arith.constant 0 : i32
    %c0_i32_1 = arith.constant 0 : i32
    return %c0_i32, %c0_i32_0 : i32, i32
  }
  func.func @transform_10(%arg0: i32) -> (i32, i32) {
    %c0_i32 = arith.constant 0 : i32
    %c0_i32_0 = arith.constant 0 : i32
    %c0_i32_1 = arith.constant 0 : i32
    return %c0_i32, %c0_i32_0 : i32, i32
  }
  func.func @transform_11(%arg0: i32) -> (i32, i32) {
    %c0_i32 = arith.constant 0 : i32
    %c0_i32_0 = arith.constant 0 : i32
    %c0_i32_1 = arith.constant 0 : i32
    return %c0_i32, %c0_i32_0 : i32, i32
  }
  func.func @transform_12(%arg0: i32) -> (i32, i32) {
    %c0_i32 = arith.constant 0 : i32
    %c0_i32_0 = arith.constant 0 : i32
    %c0_i32_1 = arith.constant 0 : i32
    return %c0_i32, %c0_i32_0 : i32, i32
  }
  func.func @transform_13(%arg0: i32) -> (i32, i32) {
    %c0_i32 = arith.constant 0 : i32
    %c0_i32_0 = arith.constant 0 : i32
    %c0_i32_1 = arith.constant 0 : i32
    return %c0_i32, %c0_i32_0 : i32, i32
  }
  func.func @transform_14(%arg0: i32) -> (i32, i32) {
    %c0_i32 = arith.constant 0 : i32
    %c0_i32_0 = arith.constant 0 : i32
    %c0_i32_1 = arith.constant 0 : i32
    return %c0_i32, %c0_i32_0 : i32, i32
  }
  func.func @transform_15(%arg0: i32) -> (i32, i32) {
    %c0_i32 = arith.constant 0 : i32
    %c0_i32_0 = arith.constant 0 : i32
    %c0_i32_1 = arith.constant 0 : i32
    return %c0_i32, %c0_i32_0 : i32, i32
  }
  func.func @transform_16(%arg0: i32) -> (i32, i32) {
    %c0_i32 = arith.constant 0 : i32
    %c0_i32_0 = arith.constant 0 : i32
    %c0_i32_1 = arith.constant 0 : i32
    return %c0_i32, %c0_i32_0 : i32, i32
  }
}

</mosaic_0001>

<bundles_post_ra>
// kernel: tpu_custom_call.1
= control target key start
LH: loop header
LB: loop body
LE: loop exit
PB: predicated region body
PF: predicated region fallthrough
CT: control target
= control target key end

     0   :  { %s2912_s0 = inlined_call_operand.vmem [shape: f32[32,32], index: 0, kind: input, shape index: {}]   ;;  %s2913_s1 = inlined_call_operand.vmem [shape: f32[32,32], index: 1, kind: input, shape index: {}]   ;;  %s2914_s2 = inlined_call_operand.vmem [shape: f32[32,32], index: 2, kind: input, shape index: {}]   ;;  %s2915_s3 = inlined_call_operand.vmem [shape: f32[3,32,32], index: 3, kind: input, shape index: {}]   ;;  %s2916_s4 = inlined_call_operand.vmem [shape: f32[3,32,1], index: 4, kind: input, shape index: {}]   ;;  %s2917_s5 = inlined_call_operand.hbm [shape: f32[32,32], index: 5, kind: input, shape index: {}]   ;;  %s2918_s6 = inlined_call_operand.vmem [shape: f32[1,32], index: 6, kind: input, shape index: {}]   ;;  %s2919_s7 = inlined_call_operand.vmem [shape: f32[1,32], index: 7, kind: input, shape index: {}]   ;;  %s2920_s8 = inlined_call_operand.vmem [shape: f32[1,32], index: 8, kind: input, shape index: {}]   ;;  %s2921_s9 = inlined_call_operand.hbm [shape: f32[32,64], index: 9, kind: input, shape index: {}]   ;;  %s2922_s10 = inlined_call_operand.vmem [shape: f32[1,64], index: 10, kind: input, shape index: {}]   ;;  %s2923_s11 = inlined_call_operand.vmem [shape: f32[64,32], index: 11, kind: input, shape index: {}]   ;;  %s2924_s12 = inlined_call_operand.vmem [shape: f32[1,32], index: 12, kind: input, shape index: {}]   ;;  %s2925_s13 = inlined_call_operand.vmem [shape: f32[1,32], index: 13, kind: input, shape index: {}]   ;;  %s2926_s14 = inlined_call_operand.vmem [shape: f32[1,32], index: 14, kind: input, shape index: {}]   ;;  %s2927_s15 = inlined_call_operand.hbm [shape: f32[32,32], index: 15, kind: output, shape index: {0}]   ;;  %s2928_s16 = inlined_call_operand.hbm [shape: f32[32,32], index: 16, kind: output, shape index: {1}]  }
   0x1   :  { %2930 = sst [smem:[#allocation14_spill]] %s2912_s0 }
   0x2   :  { %22 = vsyncpa [#allocation3], 0 }
   0x3   :  { %23 = vsyncpa [#allocation6], 0 }
   0x4   :  { %24 = vsyncpa [#allocation4], 0 }
   0x5   :  { %25 = vsyncpa [#allocation9], 0  ;;  %s40_s23 = sshll.u32 %s2917_s5, 4  ;;  %s1993_s24 = smov [#allocation2]   ;;  %s41_s23 = int_to_ptr.hbm [resolvable:$true] %s40_s23 }
   0x6   :  { %s42_s25 = sshll.u32 %s1993_s24, 4  ;;  %s59_s28 = sshll.u32 %s2921_s9, 4  ;;  %s43_s25 = int_to_ptr.vmem [resolvable:$true] %s42_s25  ;;  %s60_s28 = int_to_ptr.hbm [resolvable:$true] %s59_s28 }
   0x7   :  { %s1994_s29 = smov 128   ;;  %s1995_s30 = smov 8  }
   0x8   :  { %48 = dma.hbm_to_vmem [thread:$0]  %s41_s23, 512, %s43_s25, [#allocation3], %s1994_s29, %s1994_s29, %s1995_s30  }
   0x9   :  { %s1996_s0 = smov [#allocation5]  }
   0xa   :  { %s61_s17 = sshll.u32 %s1996_s0, 4  ;;  %s62_s17 = int_to_ptr.vmem [resolvable:$true] %s61_s17 }
   0xb   :  { %67 = dma.hbm_to_vmem [thread:$0]  %s60_s28, 512, %s62_s17, [#allocation6], %s1994_s29, %s1994_s29, %s1995_s30  }
   0xc   :  { %1985 = dma.done.wait [#allocation3], 512  }
   0xd   :  { %1986 = vsyncadd [#allocation3], 4294966784 }
   0xe   :  { %1987 = dma.done.wait [#allocation6], 512  }
   0xf   :  { %1988 = vsyncadd [#allocation6], 4294966784  ;;  %v1997_v0 = vmov 0   ;;  %v1700_v1 = vld [vmem:[%s2915_s3 + $0x20] sm:$0xff]  ;;  %vm154_vm0 = vcmask 261120   ;;  %v93_v3 = vld [vmem:[%s2913_s1 + $0x18] sm:$0xff] }
  0x10   :  { %1793 = vset.pattern.permute.xlu2 %v1997_v0  ;;  %v94_v2 = vld [vmem:[%s2915_s3] sm:$0xff]  ;;  %238 = vxpose.xlu1.b32.start [1/4] (short) (narrow) %v1700_v1, 32  ;;  %v1701_v5 = vld [vmem:[%s2915_s3 + $0x28] sm:$0xff]  ;;  %v92_v7 = vld [vmem:[%s2913_s1 + $0x10] sm:$0xff]  ;;  %vm450_vm1 = vcmask 64512   ;;  %s1999_s18 = smov [#allocation7]  }
  0x11   :  { %122 = vxpose.xlu0.b32.start [1/4] (short) (narrow) %v94_v2, 32  ;;  %1692 = vmatpush.xpose.msk.msra.mxu0 %vm154_vm0, %v93_v3  ;;  %v98_v4 = vld [vmem:[%s2916_s4] sm:$0xff]  ;;  %v95_v6 = vld [vmem:[%s2915_s3 + $0x8] sm:$0xff]  ;;  %v1702_v11 = vld [vmem:[%s2915_s3 + $0x30] sm:$0xff]  ;;  %s1660_s21 = sshll.u32 %s2927_s15, 4  ;;  %s2000_s15 = smov [#allocation8]   ;;  %s1661_s21 = int_to_ptr.hbm [resolvable:$true] %s1660_s21 }
  0x12   :  { %1780 = vmatpush.xpose.msk.msra.mxu1 %vm154_vm0, %v93_v3  ;;  %104 = vperm.xlu2 %1793, %v98_v4   ;;  %v91_v8 = vld [vmem:[%s2913_s1 + $0x8] sm:$0xff]  ;;  %v1704_v9 = vld [vmem:[%s2916_s4 + $0x20] sm:$0xff]  ;;  %v96_v12 = vld [vmem:[%s2915_s3 + $0x10] sm:$0xff]  ;;  %s1671_s22 = sshll.u32 %s2000_s15, 4  ;;  %s1672_s22 = int_to_ptr.vmem [resolvable:$true] %s1671_s22 }
  0x13   :  { %1724 = vmatpush.xpose.msk.msra.mxu2 %vm154_vm0, %v93_v3  ;;  %v90_v10 = vld [vmem:[%s2913_s1] sm:$0xff]  ;;  %v1703_v13 = vld [vmem:[%s2915_s3 + $0x38] sm:$0xff]  ;;  %v99_v15 = vld [vmem:[%s2916_s4 + $0x8] sm:$0xff] }
  0x14   :  { %v97_v14 = vld [vmem:[%s2915_s3 + $0x18] sm:$0xff]  ;;  %v100_v16 = vld [vmem:[%s2916_s4 + $0x10] sm:$0xff]  ;;  %v1705_v37 = vld [vmem:[%s2916_s4 + $0x28] sm:$0xff] }
  0x15   :  { %1693 = vmatpush.xpose.msk.msra.mxu0 %vm154_vm0, %v92_v7  ;;  %v101_v17 = vld [vmem:[%s2916_s4 + $0x18] sm:$0xff]  ;;  %v1706_v27 = vld [vmem:[%s2916_s4 + $0x30] sm:$0xff]  ;;  %v1716_v53 = vld [vmem:[%s2915_s3 + $0x40] sm:$0xff] }
  0x16   :  { %1781 = vmatpush.xpose.msk.msra.mxu1 %vm154_vm0, %v92_v7  ;;  %v1707_v18 = vld [vmem:[%s2916_s4 + $0x38] sm:$0xff]  ;;  %v1717_v55 = vld [vmem:[%s2915_s3 + $0x48] sm:$0xff]  ;;  %v1718_v58 = vld [vmem:[%s2915_s3 + $0x50] sm:$0xff] }
  0x17   :  { %1725 = vmatpush.xpose.msk.msra.mxu2 %vm154_vm0, %v92_v7  ;;  %v1719_v61 = vld [vmem:[%s2915_s3 + $0x58] sm:$0xff]  ;;  %s2951_s3 = sld [smem:[#allocation14_spill]] }
  0x18   :  { %239 = vxpose.xlu1.b32.cont [2/4] (short) (narrow) %v1701_v5, 32 }
  0x19   :  { %123 = vxpose.xlu0.b32.cont [2/4] (short) (narrow) %v95_v6, 32  ;;  %1694 = vmatpush.xpose.msk.msra.mxu0 %vm154_vm0, %v91_v8 }
  0x1a   :  { %1782 = vmatpush.xpose.msk.msra.mxu1 %vm154_vm0, %v91_v8  ;;  %220 = vperm.xlu2 %1793, %v1704_v9   ;;  %v414_v9 = vld [vmem:[%s2914_s2] sm:$0xff] }
  0x1b   :  { %1726 = vmatpush.xpose.msk.msra.mxu2 %vm154_vm0, %v91_v8 }
  0x1d   :  { %1695 = vmatpush.xpose.msk.msra.mxu0 %vm154_vm0, %v90_v10 }
  0x1e   :  { %1783 = vmatpush.xpose.msk.msra.mxu1 %vm154_vm0, %v90_v10 }
  0x1f   :  { %1727 = vmatpush.xpose.msk.msra.mxu2 %vm154_vm0, %v90_v10 }
  0x20   :  { %240 = vxpose.xlu1.b32.cont [3/4] (short) (narrow) %v1702_v11, 32 }
  0x21   :  { %1708 = vmatpush.xpose.msk.msrb.mxu0 %vm154_vm0, %v93_v3  ;;  %124 = vxpose.xlu0.b32.cont [3/4] (short) (narrow) %v96_v12, 32 }
  0x22   :  { %109 = vperm.xlu2 %1793, %v99_v15  }
  0x25   :  { %1709 = vmatpush.xpose.msk.msrb.mxu0 %vm154_vm0, %v92_v7 }
  0x28   :  { %241 = vxpose.xlu1.b32.end [4/4] (short) (narrow) %v1703_v13, 32  ;;  %v415_v13 = vld [vmem:[%s2914_s2 + $0x8] sm:$0xff] }
  0x29   :  { %1710 = vmatpush.xpose.msk.msrb.mxu0 %vm154_vm0, %v91_v8  ;;  %125 = vxpose.xlu0.b32.end [4/4] (short) (narrow) %v97_v14, 32 }
  0x2a   :  { %114 = vperm.xlu2 %1793, %v100_v16  }
  0x2d   :  { %1711 = vmatpush.xpose.msk.msrb.mxu0 %vm154_vm0, %v90_v10 }
  0x32   :  { %119 = vperm.xlu2 %1793, %v101_v17   ;;  %v416_v17 = vld [vmem:[%s2914_s2 + $0x10] sm:$0xff] }
  0x3a   :  { %235 = vperm.xlu2 %1793, %v1707_v18  }
  0x6c   :  { %v105_v28 = vpop.permute.xlu2 %104 }
  0x74   :  { %v221_v29 = vpop.permute.xlu2 %220 }
  0x7b   :  { %1794 = vset.pattern.permute.xlu1 %v1997_v0 }
  0x7c   :  { %v110_v30 = vpop.permute.xlu2 %109 }
  0x82   :  { %225 = vperm.xlu1 %1794, %v1705_v37  }
  0x84   :  { %v115_v33 = vpop.permute.xlu2 %114 }
  0x8c   :  { %v120_v38 = vpop.permute.xlu2 %119 }
  0x90   :  { %1795 = vset.pattern.permute.xlu0 %v1997_v0 }
  0x94   :  { %v236_v41 = vpop.permute.xlu2 %235 }
  0x97   :  { %230 = vperm.xlu0 %1795, %v1706_v27  }
  0xb4   :  { %v254_v19 = vpop.trf.xlu1 }
  0xb5   :  { %v138_v20 = vpop.trf.xlu0 }
  0xb6   :  { %1696 = vmatmul.msk.f32.vlgmr.msra.gmra.mxu0 %vm154_vm0, %v138_v20 }
  0xb7   :  { %341 = vxpose.xlu1.b32.start [1/4] (short) (narrow) %v1716_v53, 32 }
  0xbc   :  { %v255_v21 = vpop.trf.xlu1 }
  0xbd   :  { %v139_v22 = vpop.trf.xlu0  ;;  %1713 = vmatmul.msk.f32.vlgmr.msra.gmra.mxu1 %vm154_vm0, %v255_v21  ;;  %v417_v21 = vld [vmem:[%s2914_s2 + $0x18] sm:$0xff] }
  0xbe   :  { %1697 = vmatmul.msk.f32.gmra.mxu0 %vm154_vm0, %v139_v22 }
  0xbf   :  { %342 = vxpose.xlu1.b32.cont [2/4] (short) (narrow) %v1717_v55, 32 }
  0xc4   :  { %v256_v23 = vpop.trf.xlu1 }
  0xc5   :  { %v140_v24 = vpop.trf.xlu0  ;;  %1714 = vmatmul.msk.f32.gmra.mxu1 %vm154_vm0, %v256_v23 }
  0xc6   :  { %1698 = vmatmul.msk.f32.gmra.mxu0 %vm154_vm0, %v140_v24 }
  0xc7   :  { %343 = vxpose.xlu1.b32.cont [3/4] (short) (narrow) %v1718_v58, 32 }
  0xcc   :  { %v257_v25 = vpop.trf.xlu1 }
  0xcd   :  { %v141_v26 = vpop.trf.xlu0  ;;  %1715 = vmatmul.msk.f32.gmra.mxu1 %vm154_vm0, %v257_v25 }
  0xce   :  { %1699 = vmatmul.msk.f32.gmra.mxu0 %vm154_vm0, %v141_v26 }
  0xcf   :  { %344 = vxpose.xlu1.b32.end [4/4] (short) (narrow) %v1719_v61, 32 }
  0xd6   :  { %1712 = vmatmul.msk.f32.vlgmr.msrb.gmra.mxu0 %vm154_vm0, %v254_v19 }
  0xf4   :  { %v226_v51 = vpop.permute.xlu1 %225 }
 0x109   :  { %v231_v48 = vpop.permute.xlu0 %230 }
 0x133   :  { %v196_v31 = vpop.f32.mrf.mxu0 }
 0x134   :  { %v197_v32 = vadd.f32 %v196_v31, %v105_v28 }
 0x136   :  { %418 = vxpose.xlu0.b32.start.end [1/1] (short) (narrow) %v197_v32, 32 }
 0x13a   :  { %v302_v35 = vpop.f32.mrf.mxu1 }
 0x13b   :  { %v199_v34 = vpop.f32.mrf.mxu0  ;;  %v303_v52 = vadd.f32 %v302_v35, %v226_v51 }
 0x13c   :  { %v200_v36 = vadd.f32 %v199_v34, %v110_v30 }
 0x13e   :  { %492 = vxpose.xlu2.b32.start.end [1/1] (short) (narrow) %v200_v36, 32 }
 0x142   :  { %v305_v40 = vpop.f32.mrf.mxu1 }
 0x143   :  { %v202_v39 = vpop.f32.mrf.mxu0  ;;  %v306_v49 = vadd.f32 %v305_v40, %v231_v48 }
 0x144   :  { %v203_v47 = vadd.f32 %v202_v39, %v115_v33 }
 0x145   :  { %624 = vmatpush.msra.mxu0 %v306_v49 }
 0x14a   :  { %v308_v43 = vpop.f32.mrf.mxu1 }
 0x14b   :  { %v205_v42 = vpop.f32.mrf.mxu0  ;;  %v309_v44 = vadd.f32 %v308_v43, %v236_v41 }
 0x14c   :  { %v206_v50 = vadd.f32 %v205_v42, %v120_v38 }
 0x14d   :  { %697 = vmatpush.msrb.mxu1 %v309_v44 }
 0x153   :  { %v299_v45 = vpop.f32.mrf.mxu0 }
 0x154   :  { %v300_v46 = vadd.f32 %v299_v45, %v221_v29 }
 0x156   :  { %478 = vmatpush.msra.mxu3 %v300_v46 }
 0x158   :  { %551 = vmatpush.msrb.mxu3 %v303_v52 }
 0x15b   :  { %v357_v43 = vpop.trf.xlu1 }
 0x15c   :  { %1728 = vmatmul.msk.f32.vlgmr.msra.gmra.mxu2 %vm154_vm0, %v357_v43 }
 0x15e   :  { %565 = vxpose.xlu2.b32.start.end [1/1] (short) (narrow) %v203_v47, 32 }
 0x163   :  { %v358_v47 = vpop.trf.xlu1 }
 0x164   :  { %1729 = vmatmul.msk.f32.gmra.mxu2 %vm154_vm0, %v358_v47 }
 0x16b   :  { %v359_v52 = vpop.trf.xlu1 }
 0x16c   :  { %1730 = vmatmul.msk.f32.gmra.mxu2 %vm154_vm0, %v359_v52 }
 0x17e   :  { %638 = vxpose.xlu2.b32.start.end [1/1] (short) (narrow) %v206_v50, 32 }
 0x1d7   :  { %v508_v54 = vpop.trf.xlu2 }
 0x1da   :  { %v434_v56 = vpop.trf.xlu0 }
 0x1db   :  { %1732 = vmatmul.msk.f32.vlgmr.msra.gmra.mxu3 %vm450_vm1, %v434_v56  ;;  %v360_v56 = vpop.trf.xlu1 }
 0x1dc   :  { %1731 = vmatmul.msk.f32.gmra.mxu2 %vm154_vm0, %v360_v56 }
 0x1df   :  { %v509_v57 = vpop.trf.xlu2 }
 0x1e2   :  { %v435_v59 = vpop.trf.xlu0 }
 0x1e3   :  { %1733 = vmatmul.msk.f32.gmra.mxu3 %vm450_vm1, %v435_v59 }
 0x1e7   :  { %v510_v60 = vpop.trf.xlu2 }
 0x1ea   :  { %v436_v62 = vpop.trf.xlu0 }
 0x1eb   :  { %1734 = vmatmul.msk.f32.gmra.mxu3 %vm450_vm1, %v436_v62 }
 0x1ef   :  { %v511_v63 = vpop.trf.xlu2 }
 0x1f2   :  { %v437_v0 = vpop.trf.xlu0 }
 0x1f3   :  { %1735 = vmatmul.msk.f32.gmra.mxu3 %vm450_vm1, %v437_v0 }
 0x1f7   :  { %v581_v1 = vpop.trf.xlu2 }
 0x1f8   :  { %1740 = vmatmul.msk.f32.vlgmr.msra.gmra.mxu0 %vm450_vm1, %v581_v1 }
 0x1fb   :  { %1736 = vmatmul.msk.f32.vlgmr.msrb.gmra.mxu3 %vm450_vm1, %v508_v54 }
 0x1ff   :  { %v582_v2 = vpop.trf.xlu2 }
 0x200   :  { %1741 = vmatmul.msk.f32.gmra.mxu0 %vm450_vm1, %v582_v2 }
 0x203   :  { %1737 = vmatmul.msk.f32.gmra.mxu3 %vm450_vm1, %v509_v57 }
 0x207   :  { %v583_v3 = vpop.trf.xlu2 }
 0x208   :  { %1742 = vmatmul.msk.f32.gmra.mxu0 %vm450_vm1, %v583_v3 }
 0x20b   :  { %1738 = vmatmul.msk.f32.gmra.mxu3 %vm450_vm1, %v510_v60 }
 0x20f   :  { %v584_v4 = vpop.trf.xlu2 }
 0x210   :  { %1743 = vmatmul.msk.f32.gmra.mxu0 %vm450_vm1, %v584_v4 }
 0x213   :  { %1739 = vmatmul.msk.f32.gmra.mxu3 %vm450_vm1, %v511_v63 }
 0x217   :  { %v654_v5 = vpop.trf.xlu2 }
 0x218   :  { %1744 = vmatmul.msk.f32.vlgmr.msrb.gmra.mxu1 %vm450_vm1, %v654_v5 }
 0x21f   :  { %v655_v6 = vpop.trf.xlu2 }
 0x220   :  { %1745 = vmatmul.msk.f32.gmra.mxu1 %vm450_vm1, %v655_v6 }
 0x227   :  { %v656_v7 = vpop.trf.xlu2 }
 0x228   :  { %1746 = vmatmul.msk.f32.gmra.mxu1 %vm450_vm1, %v656_v7 }
 0x22f   :  { %v657_v8 = vpop.trf.xlu2 }
 0x230   :  { %1747 = vmatmul.msk.f32.gmra.mxu1 %vm450_vm1, %v657_v8 }
 0x25e   :  { %v480_v10 = vpop.f32.mrf.mxu3 }
 0x25f   :  { %v2213_v11 = vadd.f32 %v480_v10, %v414_v9 }
 0x261   :  { %v711_v12 = vsel %vm154_vm0, %v2213_v11, -inf }
 0x262   :  { %712 = vmax.xlane.f32.xlu0 %v711_v12 }
 0x266   :  { %v483_v14 = vpop.f32.mrf.mxu3 }
 0x267   :  { %v2220_v15 = vadd.f32 %v483_v14, %v415_v13 }
 0x269   :  { %v714_v16 = vsel %vm154_vm0, %v2220_v15, -inf }
 0x26a   :  { %715 = vmax.xlane.f32.xlu1 %v714_v16 }
 0x26e   :  { %v486_v18 = vpop.f32.mrf.mxu3 }
 0x26f   :  { %v2227_v19 = vadd.f32 %v486_v18, %v416_v17 }
 0x271   :  { %v717_v20 = vsel %vm154_vm0, %v2227_v19, -inf }
 0x272   :  { %718 = vmax.xlane.f32.xlu0 %v717_v20 }
 0x275   :  { %v626_v22 = vpop.f32.mrf.mxu0 }
 0x276   :  { %v489_v23 = vpop.f32.mrf.mxu3  ;;  %v2238_v26 = vadd.f32 %v626_v22, %v414_v9 }
 0x277   :  { %v2234_v24 = vadd.f32 %v489_v23, %v417_v21 }
 0x278   :  { %v735_v30 = vsel %vm154_vm0, %v2238_v26, -inf }
 0x279   :  { %v720_v25 = vsel %vm154_vm0, %v2234_v24, -inf }
 0x27a   :  { %721 = vmax.xlane.f32.xlu2 %v720_v25 }
 0x27d   :  { %v629_v27 = vpop.f32.mrf.mxu0 }
 0x27e   :  { %v2240_v28 = vadd.f32 %v629_v27, %v415_v13  ;;  %v553_v34 = vpop.f32.mrf.mxu3 }
 0x27f   :  { %v2250_v35 = vadd.f32 %v553_v34, %v414_v9 }
 0x280   :  { %v738_v29 = vsel %vm154_vm0, %v2240_v28, -inf }
 0x281   :  { %739 = vmax.xlane.f32.xlu0 %v738_v29  ;;  %v723_v36 = vsel %vm154_vm0, %v2250_v35, -inf }
 0x282   :  { %736 = vmax.xlane.f32.xlu2 %v735_v30 }
 0x285   :  { %v632_v31 = vpop.f32.mrf.mxu0 }
 0x286   :  { %v2246_v32 = vadd.f32 %v632_v31, %v416_v17  ;;  %v556_v51 = vpop.f32.mrf.mxu3 }
 0x287   :  { %v2273_v53 = vadd.f32 %v556_v51, %v415_v13 }
 0x288   :  { %v741_v33 = vsel %vm154_vm0, %v2246_v32, -inf }
 0x289   :  { %742 = vmax.xlane.f32.xlu0 %v741_v33  ;;  %v726_v55 = vsel %vm154_vm0, %v2273_v53, -inf }
 0x28d   :  { %v635_v37 = vpop.f32.mrf.mxu0 }
 0x28e   :  { %v2254_v38 = vadd.f32 %v635_v37, %v417_v21  ;;  %v559_v59 = vpop.f32.mrf.mxu3 }
 0x28f   :  { %v2282_v60 = vadd.f32 %v559_v59, %v416_v17 }
 0x290   :  { %v744_v41 = vsel %vm154_vm0, %v2254_v38, -inf }
 0x291   :  { %724 = vmax.xlane.f32.xlu0 %v723_v36  ;;  %v729_v61 = vsel %vm154_vm0, %v2282_v60, -inf }
 0x295   :  { %v699_v39 = vpop.f32.mrf.mxu1 }
 0x296   :  { %v2256_v40 = vadd.f32 %v699_v39, %v414_v9  ;;  %v562_v62 = vpop.f32.mrf.mxu3 }
 0x297   :  { %v2286_v63 = vadd.f32 %v562_v62, %v417_v21 }
 0x298   :  { %v747_v42 = vsel %vm154_vm0, %v2256_v40, -inf }
 0x299   :  { %745 = vmax.xlane.f32.xlu0 %v744_v41  ;;  %748 = vmax.xlane.f32.xlu2 %v747_v42  ;;  %v732_v0 = vsel %vm154_vm0, %v2286_v63, -inf }
 0x29d   :  { %v702_v44 = vpop.f32.mrf.mxu1 }
 0x29e   :  { %v2263_v45 = vadd.f32 %v702_v44, %v415_v13 }
 0x2a0   :  { %v750_v46 = vsel %vm154_vm0, %v2263_v45, -inf }
 0x2a1   :  { %751 = vmax.xlane.f32.xlu1 %v750_v46 }
 0x2a5   :  { %v705_v48 = vpop.f32.mrf.mxu1 }
 0x2a6   :  { %v2268_v49 = vadd.f32 %v705_v48, %v416_v17 }
 0x2a8   :  { %v753_v50 = vsel %vm154_vm0, %v2268_v49, -inf }
 0x2a9   :  { %754 = vmax.xlane.f32.xlu0 %v753_v50 }
 0x2ad   :  { %v708_v54 = vpop.f32.mrf.mxu1 }
 0x2ae   :  { %v2277_v57 = vadd.f32 %v708_v54, %v417_v21 }
 0x2b0   :  { %v756_v58 = vsel %vm154_vm0, %v2277_v57, -inf }
 0x2b1   :  { %727 = vmax.xlane.f32.xlu0 %v726_v55 }
 0x2b9   :  { %757 = vmax.xlane.f32.xlu0 %v756_v58 }
 0x2c1   :  { %730 = vmax.xlane.f32.xlu0 %v729_v61 }
 0x2c9   :  { %733 = vmax.xlane.f32.xlu0 %v732_v0 }
 0x2d5   :  { %v713_v1 = vpop.xlane.xlu0 %712 }
 0x2d6   :  { %v759_v2 = vsub.f32 %v2213_v11, %v713_v1 }
 0x2d8   :  { %v775_v3 = vmul.f32 1.442695, %v759_v2 }
 0x2da   :  { %1803 = vpow2.f32 %v775_v3 }
 0x2dd   :  { %v716_v4 = vpop.xlane.xlu1 %715 }
 0x2de   :  { %v760_v5 = vsub.f32 %v2220_v15, %v716_v4 }
 0x2e0   :  { %v2292_v6 = vpop.eup %1803  ;;  %v777_v7 = vmul.f32 1.442695, %v760_v5 }
 0x2e1   :  { %v807_v8 = vsel %vm154_vm0, %v2292_v6, 0.0 }
 0x2e2   :  { %1805 = vpow2.f32 %v777_v7  ;;  %808 = vadd.xlane.f32.xlu2 %v807_v8 }
 0x2e5   :  { %v719_v9 = vpop.xlane.xlu0 %718 }
 0x2e6   :  { %v761_v10 = vsub.f32 %v2227_v19, %v719_v9 }
 0x2e8   :  { %v2297_v12 = vpop.eup %1805  ;;  %v779_v13 = vmul.f32 1.442695, %v761_v10 }
 0x2e9   :  { %v810_v11 = vsel %vm154_vm0, %v2297_v12, 0.0 }
 0x2ea   :  { %1807 = vpow2.f32 %v779_v13  ;;  %811 = vadd.xlane.f32.xlu2 %v810_v11 }
 0x2ed   :  { %v722_v14 = vpop.xlane.xlu2 %721 }
 0x2ee   :  { %v762_v43 = vsub.f32 %v2234_v24, %v722_v14 }
 0x2f0   :  { %v2301_v15 = vpop.eup %1807  ;;  %v781_v48 = vmul.f32 1.442695, %v762_v43 }
 0x2f1   :  { %v813_v16 = vsel %vm154_vm0, %v2301_v15, 0.0 }
 0x2f2   :  { %814 = vadd.xlane.f32.xlu1 %v813_v16 }
 0x2f4   :  { %v740_v17 = vpop.xlane.xlu0 %739 }
 0x2f5   :  { %v737_v18 = vpop.xlane.xlu2 %736  ;;  %v768_v19 = vsub.f32 %v2240_v28, %v740_v17 }
 0x2f6   :  { %v767_v20 = vsub.f32 %v2238_v26, %v737_v18 }
 0x2f7   :  { %v793_v22 = vmul.f32 1.442695, %v768_v19 }
 0x2f8   :  { %v791_v21 = vmul.f32 1.442695, %v767_v20  ;;  %v1720_v20 = vld [vmem:[%s2916_s4 + $0x40] sm:$0xff] }
 0x2fa   :  { %1809 = vpow2.f32 %v791_v21 }
 0x2fb   :  { %1811 = vpow2.f32 %v793_v22  ;;  %v1722_v22 = vld [vmem:[%s2916_s4 + $0x50] sm:$0xff] }
 0x2fc   :  { %v743_v23 = vpop.xlane.xlu0 %742 }
 0x2fd   :  { %v769_v25 = vsub.f32 %v2246_v32, %v743_v23  ;;  %v1723_v23 = vld [vmem:[%s2916_s4 + $0x58] sm:$0xff] }
 0x2ff   :  { %v795_v27 = vmul.f32 1.442695, %v769_v25 }
 0x300   :  { %v2308_v29 = vpop.eup %1809 }
 0x301   :  { %1813 = vpow2.f32 %v795_v27  ;;  %v831_v30 = vsel %vm154_vm0, %v2308_v29, 0.0  ;;  %v2313_v33 = vpop.eup %1811 }
 0x302   :  { %832 = vadd.xlane.f32.xlu0 %v831_v30  ;;  %v834_v36 = vsel %vm154_vm0, %v2313_v33, 0.0 }
 0x304   :  { %v725_v31 = vpop.xlane.xlu0 %724 }
 0x305   :  { %v763_v26 = vsub.f32 %v2250_v35, %v725_v31 }
 0x307   :  { %v2315_v28 = vpop.eup %1813  ;;  %v783_v34 = vmul.f32 1.442695, %v763_v26 }
 0x308   :  { %v837_v32 = vsel %vm154_vm0, %v2315_v28, 0.0 }
 0x309   :  { %1815 = vpow2.f32 %v783_v34  ;;  %838 = vadd.xlane.f32.xlu1 %v837_v32 }
 0x30a   :  { %835 = vadd.xlane.f32.xlu0 %v834_v36 }
 0x30c   :  { %v749_v37 = vpop.xlane.xlu2 %748  ;;  %v746_v39 = vpop.xlane.xlu0 %745 }
 0x30d   :  { %v771_v41 = vsub.f32 %v2256_v40, %v749_v37  ;;  %v770_v35 = vsub.f32 %v2254_v38, %v746_v39 }
 0x30f   :  { %v2323_v42 = vpop.eup %1815  ;;  %v799_v44 = vmul.f32 1.442695, %v771_v41  ;;  %v797_v46 = vmul.f32 1.442695, %v770_v35 }
 0x310   :  { %v819_v47 = vsel %vm154_vm0, %v2323_v42, 0.0 }
 0x311   :  { %1817 = vpow2.f32 %v799_v44  ;;  %820 = vadd.xlane.f32.xlu1 %v819_v47 }
 0x312   :  { %1819 = vpow2.f32 %v797_v46 }
 0x313   :  { %1821 = vpow2.f32 %v781_v48 }
 0x314   :  { %v752_v50 = vpop.xlane.xlu1 %751 }
 0x315   :  { %v772_v51 = vsub.f32 %v2263_v45, %v752_v50 }
 0x317   :  { %v2329_v52 = vpop.eup %1817  ;;  %v801_v38 = vmul.f32 1.442695, %v772_v51 }
 0x318   :  { %v2331_v40 = vpop.eup %1819  ;;  %v843_v24 = vsel %vm154_vm0, %v2329_v52, 0.0 }
 0x319   :  { %1823 = vpow2.f32 %v801_v38  ;;  %844 = vadd.xlane.f32.xlu0 %v843_v24  ;;  %v840_v54 = vsel %vm154_vm0, %v2331_v40, 0.0  ;;  %v2337_v56 = vpop.eup %1821 }
 0x31a   :  { %841 = vadd.xlane.f32.xlu1 %v840_v54  ;;  %v816_v62 = vsel %vm154_vm0, %v2337_v56, 0.0 }
 0x31c   :  { %v755_v55 = vpop.xlane.xlu0 %754 }
 0x31d   :  { %v773_v45 = vsub.f32 %v2268_v49, %v755_v55 }
 0x31f   :  { %v2340_v58 = vpop.eup %1823  ;;  %v803_v59 = vmul.f32 1.442695, %v773_v45 }
 0x320   :  { %v846_v61 = vsel %vm154_vm0, %v2340_v58, 0.0 }
 0x321   :  { %1825 = vpow2.f32 %v803_v59  ;;  %847 = vadd.xlane.f32.xlu2 %v846_v61  ;;  %817 = vadd.xlane.f32.xlu0 %v816_v62 }
 0x324   :  { %v728_v0 = vpop.xlane.xlu0 %727 }
 0x325   :  { %v764_v1 = vsub.f32 %v2273_v53, %v728_v0 }
 0x327   :  { %v2347_v2 = vpop.eup %1825  ;;  %v785_v3 = vmul.f32 1.442695, %v764_v1 }
 0x328   :  { %v849_v49 = vsel %vm154_vm0, %v2347_v2, 0.0 }
 0x329   :  { %1827 = vpow2.f32 %v785_v3  ;;  %850 = vadd.xlane.f32.xlu1 %v849_v49 }
 0x32c   :  { %v758_v4 = vpop.xlane.xlu0 %757 }
 0x32d   :  { %v774_v5 = vsub.f32 %v2277_v57, %v758_v4 }
 0x32f   :  { %v2352_v7 = vpop.eup %1827  ;;  %v805_v8 = vmul.f32 1.442695, %v774_v5 }
 0x330   :  { %v822_v9 = vsel %vm154_vm0, %v2352_v7, 0.0 }
 0x331   :  { %1829 = vpow2.f32 %v805_v8  ;;  %823 = vadd.xlane.f32.xlu2 %v822_v9 }
 0x334   :  { %v731_v53 = vpop.xlane.xlu0 %730 }
 0x335   :  { %v765_v10 = vsub.f32 %v2282_v60, %v731_v53 }
 0x337   :  { %v2357_v13 = vpop.eup %1829  ;;  %v787_v11 = vmul.f32 1.442695, %v765_v10 }
 0x338   :  { %v852_v14 = vsel %vm154_vm0, %v2357_v13, 0.0 }
 0x339   :  { %1831 = vpow2.f32 %v787_v11  ;;  %853 = vadd.xlane.f32.xlu2 %v852_v14 }
 0x33c   :  { %v734_v57 = vpop.xlane.xlu0 %733 }
 0x33d   :  { %v766_v16 = vsub.f32 %v2286_v63, %v734_v57  ;;  %v1721_v63 = vld [vmem:[%s2916_s4 + $0x48] sm:$0xff] }
 0x33f   :  { %v2362_v17 = vpop.eup %1831  ;;  %v789_v18 = vmul.f32 1.442695, %v766_v16 }
 0x340   :  { %v825_v60 = vsel %vm154_vm0, %v2362_v17, 0.0 }
 0x341   :  { %1833 = vpow2.f32 %v789_v18  ;;  %826 = vadd.xlane.f32.xlu0 %v825_v60 }
 0x342   :  { %323 = vperm.xlu1 %1794, %v1720_v20  }
 0x347   :  { %v2369_v19 = vpop.eup %1833 }
 0x348   :  { %v828_v21 = vsel %vm154_vm0, %v2369_v19, 0.0 }
 0x349   :  { %829 = vadd.xlane.f32.xlu0 %v828_v21 }
 0x351   :  { %328 = vperm.xlu2 %1793, %v1721_v63  }
 0x355   :  { %v2386_v30 = vpop.xlane.xlu2 %808 }
 0x35d   :  { %333 = vperm.xlu0 %1795, %v1722_v22   ;;  %v2396_v32 = vpop.xlane.xlu2 %811 }
 0x35e   :  { %v880_v3 = vand.u32 2147483648, %v2396_v32  ;;  %v878_v49 = vand.u32 2147483647, %v2396_v32  ;;  %vm874_vm14 = vweird.f32 %v2396_v32 }
 0x365   :  { %338 = vperm.xlu0 %1795, %v1723_v23   ;;  %v2382_v25 = vpop.xlane.xlu1 %814 }
 0x366   :  { %v894_v8 = vand.u32 2147483648, %v2382_v25  ;;  %vm888_vm4 = vweird.f32 %v2382_v25 }
 0x375   :  { %v2384_v27 = vpop.xlane.xlu0 %832 }
 0x376   :  { %vm972_vm15 = vweird.f32 %v2384_v27 }
 0x37c   :  { %v2388_v31 = vpop.xlane.xlu1 %838 }
 0x37d   :  { %1835 = vrcp.f32 %v2388_v31  ;;  %v2391_v26 = vpop.xlane.xlu0 %835  ;;  %vm1000_vm5 = vweird.f32 %v2388_v31  ;;  %v1006_v20 = vand.u32 2147483648, %v2388_v31  ;;  %v1004_v63 = vand.u32 2147483647, %v2388_v31 }
 0x37e   :  { %1837 = vrcp.f32 %v2386_v30  ;;  %vm986_vm12 = vweird.f32 %v2391_v26 }
 0x37f   :  { %1839 = vrcp.f32 %v2391_v26  ;;  %vm1005_vm13 = vcmp.eq.f32.partialorder %v1004_v63, 8.507059e+37  ;;  %v892_v63 = vand.u32 2147483647, %v2382_v25 }
 0x380   :  { %1841 = vrcp.f32 %v2396_v32 }
 0x381   :  { %1843 = vrcp.f32 %v2382_v25 }
 0x382   :  { %1845 = vrcp.f32 %v2384_v27 }
 0x383   :  { %v2400_v36 = vpop.eup %1835 }
 0x384   :  { %v2393_v34 = vpop.xlane.xlu1 %820  ;;  %v2404_v37 = vpop.eup %1837  ;;  %v996_v35 = vmul.f32 %v2400_v36, %v2388_v31  ;;  %vm1001_vm2 = vweird.f32 %v2400_v36 }
 0x385   :  { %v2408_v41 = vpop.eup %1839  ;;  %v856_v46 = vmul.f32 %v2404_v37, %v2386_v30  ;;  %vm2447_vm7 = vmor %vm1000_vm5, %vm1001_vm2 }
 0x386   :  { %v2412_v44 = vpop.eup %1841  ;;  %v982_v48 = vmul.f32 %v2408_v41, %v2391_v26  ;;  %v997_v51 = vsub.f32 1.0, %v996_v35  ;;  %vm987_vm9 = vweird.f32 %v2408_v41 }
 0x387   :  { %v2416_v47 = vpop.eup %1843  ;;  %v870_v38 = vmul.f32 %v2412_v44, %v2396_v32  ;;  %v857_v24 = vsub.f32 1.0, %v856_v46  ;;  %vm2471_vm2 = vmor %vm986_vm12, %vm987_vm9  ;;  %vm893_vm12 = vcmp.eq.f32.partialorder %v892_v63, 8.507059e+37 }
 0x388   :  { %v2420_v50 = vpop.eup %1845  ;;  %v884_v54 = vmul.f32 %v2416_v47, %v2382_v25  ;;  %v983_v59 = vsub.f32 1.0, %v982_v48  ;;  %v998_v62 = vmul.f32 %v2400_v36, %v997_v51  ;;  %vm889_vm6 = vweird.f32 %v2416_v47 }
 0x389   :  { %v968_v45 = vmul.f32 %v2420_v50, %v2384_v27  ;;  %v871_v1 = vsub.f32 1.0, %v870_v38  ;;  %v2435_v4 = vmul.f32 %v2404_v37, %v857_v24  ;;  %vm973_vm1 = vweird.f32 %v2420_v50 }
 0x38a   :  { %v885_v5 = vsub.f32 1.0, %v884_v54  ;;  %v984_v10 = vmul.f32 %v2408_v41, %v983_v59  ;;  %v999_v14 = vadd.f32 %v2400_v36, %v998_v62  ;;  %v992_v54 = vand.u32 2147483648, %v2391_v26 }
 0x38b   :  { %v969_v53 = vsub.f32 1.0, %v968_v45  ;;  %v872_v18 = vmul.f32 %v2412_v44, %v871_v1  ;;  %v990_v59 = vand.u32 2147483647, %v2391_v26 }
 0x38c   :  { %v2406_v39 = vpop.xlane.xlu0 %844  ;;  %v886_v60 = vmul.f32 %v2416_v47, %v885_v5  ;;  %v985_v46 = vadd.f32 %v2408_v41, %v984_v10  ;;  %v1003_v31 = vsel %vm2447_vm7, %v2400_v36, %v999_v14  ;;  %v978_v10 = vand.u32 2147483648, %v2384_v27  ;;  %vm2492_vm7 = vmor %vm888_vm4, %vm889_vm6 }
 0x38d   :  { %v842_v43 = vpop.xlane.xlu1 %841  ;;  %v970_v35 = vmul.f32 %v2420_v50, %v969_v53  ;;  %vm991_vm5 = vcmp.eq.f32.partialorder %v990_v59, 8.507059e+37  ;;  %vm875_vm6 = vweird.f32 %v2412_v44 }
 0x38e   :  { %1847 = vrcp.f32 %v842_v43  ;;  %v1020_v11 = vand.u32 2147483648, %v842_v43  ;;  %v1018_v16 = vand.u32 2147483647, %v842_v43  ;;  %vm1014_vm8 = vweird.f32 %v842_v43 }
 0x38f   :  { %v887_v1 = vadd.f32 %v2416_v47, %v886_v60  ;;  %v971_v26 = vadd.f32 %v2420_v50, %v970_v35  ;;  %v989_v53 = vsel %vm2471_vm2, %v2408_v41, %v985_v46  ;;  %v873_v35 = vadd.f32 %v2412_v44, %v872_v18 }
 0x390   :  { %v1021_v48 = vor.u32 1.1754944e-38, %v1020_v11  ;;  %vm1019_vm11 = vcmp.eq.f32.partialorder %v1018_v16, 8.507059e+37  ;;  %v993_v11 = vor.u32 1.1754944e-38, %v992_v54 }
 0x392   :  { %v994_v21 = vsel %vm991_vm5, %v993_v11, %v989_v53 }
 0x394   :  { %v1848_v55 = vpop.eup %1847  ;;  %v2428_v61 = vpop.xlane.xlu0 %817 }
 0x395   :  { %v1010_v0 = vmul.f32 %v1848_v55, %v842_v43  ;;  %1849 = vrcp.f32 %v2428_v61  ;;  %vm1015_vm3 = vweird.f32 %v1848_v55  ;;  %v2456_v51 = vpop.xlane.xlu2 %847  ;;  %v1007_v43 = vor.u32 1.1754944e-38, %v1006_v20 }
 0x396   :  { %vm1016_vm10 = vmor %vm1014_vm8, %vm1015_vm3  ;;  %v906_v14 = vand.u32 2147483647, %v2428_v61  ;;  %vm902_vm9 = vweird.f32 %v2428_v61 }
 0x397   :  { %v1011_v9 = vsub.f32 1.0, %v1010_v0  ;;  %vm2500_vm8 = vmor %vm972_vm15, %vm973_vm1  ;;  %vm861_vm15 = vweird.f32 %v2404_v37  ;;  %vm879_vm1 = vcmp.eq.f32.partialorder %v878_v49, 8.507059e+37 }
 0x399   :  { %v1012_v57 = vmul.f32 %v1848_v55, %v1011_v9 }
 0x39b   :  { %v1013_v22 = vadd.f32 %v1848_v55, %v1012_v57  ;;  %v1850_v23 = vpop.eup %1849  ;;  %v976_v57 = vand.u32 2147483647, %v2384_v27  ;;  %v975_v27 = vsel %vm2500_vm8, %v2420_v50, %v971_v26  ;;  %v402_v26 = vpop.f32.mrf.mxu2 }
 0x39c   :  { %v898_v24 = vmul.f32 %v1850_v23, %v2428_v61  ;;  %v2478_v9 = vpop.xlane.xlu1 %850  ;;  %vm903_vm3 = vweird.f32 %v1850_v23 }
 0x39d   :  { %v1017_v38 = vsel %vm1016_vm10, %v1848_v55, %v1013_v22  ;;  %v1008_v55 = vsel %vm1005_vm13, %v1007_v43, %v1003_v31  ;;  %1851 = vrcp.f32 %v2478_v9  ;;  %vm904_vm4 = vmor %vm902_vm9, %vm903_vm3  ;;  %vm907_vm10 = vcmp.eq.f32.partialorder %v906_v14, 8.507059e+37 }
 0x39e   :  { %v1022_v45 = vsel %vm1019_vm11, %v1021_v48, %v1017_v38  ;;  %v899_v62 = vsub.f32 1.0, %v898_v24  ;;  %v1089_v16 = vmul.f32 %v2315_v28, %v1008_v55  ;;  %v891_v48 = vsel %vm2492_vm7, %v2416_v47, %v887_v1  ;;  %vm2529_vm13 = vmor %vm874_vm14, %vm875_vm6 }
 0x39f   :  { %v1090_v0 = vmul.f32 %v2331_v40, %v1022_v45  ;;  %v908_v40 = vand.u32 2147483648, %v2428_v61  ;;  %v979_v61 = vor.u32 1.1754944e-38, %v978_v10  ;;  %v895_v38 = vor.u32 1.1754944e-38, %v894_v8 }
 0x3a0   :  { %v900_v5 = vmul.f32 %v1850_v23, %v899_v62  ;;  %vm977_vm11 = vcmp.eq.f32.partialorder %v976_v57, 8.507059e+37  ;;  %v1088_v31 = vmul.f32 %v2313_v33, %v994_v21  ;;  %1853 = vrcp.f32 %v2456_v51 }
 0x3a1   :  { %1758 = vmatpush.xpose.msk.msra.mxu3 %vm154_vm0, %v1090_v0  ;;  %v909_v22 = vor.u32 1.1754944e-38, %v908_v40  ;;  %v980_v18 = vsel %vm977_vm11, %v979_v61, %v975_v27  ;;  %v877_v33 = vsel %vm2529_vm13, %v2412_v44, %v873_v35  ;;  %v866_v8 = vand.u32 2147483648, %v2386_v30 }
 0x3a2   :  { %v901_v20 = vadd.f32 %v1850_v23, %v900_v5  ;;  %v881_v43 = vor.u32 1.1754944e-38, %v880_v3  ;;  %1855 = vrcp.f32 %v2406_v39  ;;  %v1087_v54 = vmul.f32 %v2308_v29, %v980_v18 }
 0x3a3   :  { %v2533_v47 = vpop.eup %1851  ;;  %vm860_vm14 = vweird.f32 %v2386_v30  ;;  %v864_v44 = vand.u32 2147483647, %v2386_v30  ;;  %v1062_v21 = vand.u32 2147483648, %v2478_v9  ;;  %vm1056_vm9 = vweird.f32 %v2478_v9 }
 0x3a4   :  { %v2506_v28 = vpop.xlane.xlu2 %823  ;;  %v905_v46 = vsel %vm904_vm4, %v1850_v23, %v901_v20  ;;  %v896_v23 = vsel %vm893_vm12, %v895_v38, %v891_v48  ;;  %v882_v3 = vsel %vm879_vm1, %v881_v43, %v877_v33  ;;  %vm862_vm2 = vmor %vm860_vm14, %vm861_vm15  ;;  %vm1057_vm7 = vweird.f32 %v2533_v47 }
 0x3a5   :  { %1759 = vmatpush.xpose.msk.msra.mxu3 %vm154_vm0, %v1089_v16  ;;  %v910_v24 = vsel %vm907_vm10, %v909_v22, %v905_v46  ;;  %v1081_v59 = vmul.f32 %v2301_v15, %v896_v23  ;;  %v867_v15 = vor.u32 1.1754944e-38, %v866_v8  ;;  %v1080_v32 = vmul.f32 %v2297_v12, %v882_v3  ;;  %vm2586_vm10 = vmor %vm1056_vm9, %vm1057_vm7 }
 0x3a6   :  { %v1082_v50 = vmul.f32 %v2337_v56, %v910_v24  ;;  %v859_v56 = vadd.f32 %v2404_v37, %v2435_v4  ;;  %v1052_v4 = vmul.f32 %v2533_v47, %v2478_v9  ;;  %v2555_v62 = vpop.eup %1853  ;;  %vm865_vm3 = vcmp.eq.f32.partialorder %v864_v44, 8.507059e+37 }
 0x3a7   :  { %v1038_v30 = vmul.f32 %v2555_v62, %v2456_v51  ;;  %v1060_v22 = vand.u32 2147483647, %v2478_v9  ;;  %vm1043_vm6 = vweird.f32 %v2555_v62  ;;  %v1048_v23 = vand.u32 2147483648, %v2456_v51 }
 0x3a8   :  { %1748 = vmatpush.xpose.msk.msrb.mxu2 %vm154_vm0, %v1082_v50  ;;  %v863_v29 = vsel %vm862_vm2, %v2404_v37, %v859_v56  ;;  %v2560_v49 = vpop.eup %1855  ;;  %v1053_v0 = vsub.f32 1.0, %v1052_v4  ;;  %v1063_v25 = vor.u32 1.1754944e-38, %v1062_v21  ;;  %vm1042_vm12 = vweird.f32 %v2456_v51 }
 0x3a9   :  { %1760 = vmatpush.xpose.msk.msra.mxu3 %vm154_vm0, %v1088_v31  ;;  %v868_v36 = vsel %vm865_vm3, %v867_v15, %v863_v29  ;;  %v1024_v1 = vmul.f32 %v2560_v49, %v2406_v39  ;;  %v1039_v12 = vsub.f32 1.0, %v1038_v30  ;;  %v1046_v56 = vand.u32 2147483647, %v2456_v51  ;;  %vm2609_vm15 = vmor %vm1042_vm12, %vm1043_vm6  ;;  %v1436_v15 = vld [vmem:[#allocation5 + $0x8] sm:$0xff]  ;;  %v2626_v30 = vpop.f32.mrf.mxu2 }
 0x3aa   :  { %v1079_v40 = vmul.f32 %v2292_v6, %v868_v36  ;;  %v1054_v53 = vmul.f32 %v2533_v47, %v1053_v0  ;;  %vm1061_vm13 = vcmp.eq.f32.partialorder %v1060_v22, 8.507059e+37  ;;  %vm1029_vm14 = vweird.f32 %v2560_v49 }
 0x3ab   :  { %v1025_v16 = vsub.f32 1.0, %v1024_v1  ;;  %v1040_v6 = vmul.f32 %v2555_v62, %v1039_v12  ;;  %v1034_v3 = vand.u32 2147483648, %v2406_v39  ;;  %v1049_v29 = vor.u32 1.1754944e-38, %v1048_v23 }
 0x3ac   :  { %v854_v45 = vpop.xlane.xlu2 %853  ;;  %1749 = vmatpush.xpose.msk.msrb.mxu2 %vm154_vm0, %v1081_v59  ;;  %v1055_v41 = vadd.f32 %v2533_v47, %v1054_v53  ;;  %v1437_v59 = vld [vmem:[#allocation5 + $0x10] sm:$0xff]  ;;  %vm1028_vm1 = vweird.f32 %v2406_v39  ;;  %vm1047_vm2 = vcmp.eq.f32.partialorder %v1046_v56, 8.507059e+37 }
 0x3ad   :  { %1857 = vrcp.f32 %v854_v45  ;;  %1761 = vmatpush.xpose.msk.msra.mxu3 %vm154_vm0, %v1087_v54  ;;  %v1076_v57 = vand.u32 2147483648, %v854_v45  ;;  %v1074_v60 = vand.u32 2147483647, %v854_v45  ;;  %vm1070_vm8 = vweird.f32 %v854_v45  ;;  %vm2631_vm3 = vmor %vm1028_vm1, %vm1029_vm14 }
 0x3ae   :  { %v1026_v61 = vmul.f32 %v2560_v49, %v1025_v16  ;;  %v1041_v24 = vadd.f32 %v2555_v62, %v1040_v6  ;;  %v1059_v18 = vsel %vm2586_vm10, %v2533_v47, %v1055_v41 }
 0x3af   :  { %v1077_v27 = vor.u32 1.1754944e-38, %v1076_v57  ;;  %vm1075_vm11 = vcmp.eq.f32.partialorder %v1074_v60, 8.507059e+37  ;;  %v1064_v54 = vsel %vm1061_vm13, %v1063_v25, %v1059_v18  ;;  %vm930_vm13 = vweird.f32 %v2506_v28 }
 0x3b0   :  { %1750 = vmatpush.xpose.msk.msrb.mxu2 %vm154_vm0, %v1080_v32  ;;  %v1027_v44 = vadd.f32 %v2560_v49, %v1026_v61  ;;  %v1032_v32 = vand.u32 2147483647, %v2406_v39  ;;  %v1093_v0 = vmul.f32 %v2347_v2, %v1064_v54 }
 0x3b2   :  { %v1031_v2 = vsel %vm2631_vm3, %v2560_v49, %v1027_v44 }
 0x3b3   :  { %v1858_v55 = vpop.eup %1857 }
 0x3b4   :  { %v1066_v5 = vmul.f32 %v1858_v55, %v854_v45  ;;  %v324_v37 = vpop.permute.xlu1 %323  ;;  %v2569_v11 = vpop.xlane.xlu0 %826  ;;  %1751 = vmatpush.xpose.msk.msrb.mxu2 %vm154_vm0, %v1079_v40  ;;  %vm1071_vm5 = vweird.f32 %v1858_v55  ;;  %v1438_v45 = vld [vmem:[#allocation5 + $0x18] sm:$0xff] }
 0x3b5   :  { %v403_v10 = vadd.f32 %v402_v26, %v324_v37  ;;  %1859 = vrcp.f32 %v2569_v11  ;;  %vm1072_vm4 = vmor %vm1070_vm8, %vm1071_vm5  ;;  %1467 = vmatpush.msrb.mxu3 %v1438_v45  ;;  %v1435_v26 = vld [vmem:[#allocation5] sm:$0xff]  ;;  %v1035_v37 = vor.u32 1.1754944e-38, %v1034_v3  ;;  %vm1033_vm5 = vcmp.eq.f32.partialorder %v1032_v32, 8.507059e+37  ;;  %v2711_v3 = vld [vmem:[%s2951_s3 + $0x10] sm:$0xff] }
 0x3b6   :  { %v1067_v14 = vsub.f32 1.0, %v1066_v5  ;;  %1861 = vrcp.f32 %v2506_v28  ;;  %vm944_vm9 = vweird.f32 %v2569_v11  ;;  %v948_v6 = vand.u32 2147483647, %v2569_v11  ;;  %v1494_v32 = vld [vmem:[%s2923_s11 + $0x30] sm:$0xff] }
 0x3b7   :  { %1863 = vrcp.f32 %v2393_v34  ;;  %1752 = vmatmul.msk.f32.vlgmr.msrb.gmra.mxu2 %vm154_vm0, %v403_v10  ;;  %1468 = vmatpush.msrb.mxu3 %v1437_v59  ;;  %v1036_v57 = vsel %vm1033_vm5, %v1035_v37, %v1031_v2  ;;  %v1489_v37 = vld [vmem:[%s2923_s11 + $0x8] sm:$0xff] }
 0x3b8   :  { %v1068_v20 = vmul.f32 %v1858_v55, %v1067_v14  ;;  %v1091_v21 = vmul.f32 %v2329_v52, %v1036_v57 }
 0x3b9   :  { %1469 = vmatpush.msrb.mxu3 %v1436_v15  ;;  %v1495_v15 = vld [vmem:[%s2923_s11 + $0x38] sm:$0xff] }
 0x3ba   :  { %v1069_v63 = vadd.f32 %v1858_v55, %v1068_v20  ;;  %1521 = vmatpush.msra.mxu1 %v1495_v15 }
 0x3bb   :  { %v2582_v35 = vpop.eup %1859  ;;  %1470 = vmatpush.msrb.mxu3 %v1435_v26  ;;  %v1238_v26 = vld [vmem:[#allocation2 + $0x18] sm:$0xff] }
 0x3bc   :  { %v1073_v48 = vsel %vm1072_vm4, %v1858_v55, %v1069_v63  ;;  %v2590_v38 = vpop.eup %1861  ;;  %v940_v9 = vmul.f32 %v2582_v35, %v2569_v11  ;;  %v2595_v50 = vpop.xlane.xlu0 %829  ;;  %vm945_vm7 = vweird.f32 %v2582_v35  ;;  %1522 = vmatpush.msra.mxu1 %v1494_v32 }
 0x3bd   :  { %v1078_v31 = vsel %vm1075_vm11, %v1077_v27, %v1073_v48  ;;  %1865 = vrcp.f32 %v2595_v50  ;;  %v2602_v33 = vpop.eup %1863  ;;  %v926_v47 = vmul.f32 %v2590_v38, %v2506_v28  ;;  %v964_v14 = vand.u32 2147483648, %v2595_v50  ;;  %vm2650_vm4 = vmor %vm944_vm9, %vm945_vm7  ;;  %v408_v27 = vpop.f32.mrf.mxu2 }
 0x3be   :  { %v1094_v8 = vmul.f32 %v2357_v13, %v1078_v31  ;;  %v941_v51 = vsub.f32 1.0, %v940_v9  ;;  %v1045_v13 = vsel %vm2609_vm15, %v2555_v62, %v1041_v24  ;;  %v912_v4 = vmul.f32 %v2602_v33, %v2393_v34  ;;  %v1491_v62 = vld [vmem:[%s2923_s11 + $0x18] sm:$0xff] }
 0x3bf   :  { %v927_v55 = vsub.f32 1.0, %v926_v47  ;;  %v1050_v1 = vsel %vm1047_vm2, %v1049_v29, %v1045_v13  ;;  %v962_v49 = vand.u32 2147483647, %v2595_v50  ;;  %vm958_vm6 = vweird.f32 %v2595_v50 }
 0x3c0   :  { %1763 = vmatpush.xpose.msk.msrb.mxu0 %vm154_vm0, %v1094_v8  ;;  %v942_v5 = vmul.f32 %v2582_v35, %v941_v51  ;;  %v913_v40 = vsub.f32 1.0, %v912_v4  ;;  %v1092_v53 = vmul.f32 %v2340_v58, %v1050_v1  ;;  %v950_v58 = vand.u32 2147483648, %v2569_v11  ;;  %v2691_v51 = vld [vmem:[%s2951_s3] sm:$0xff]  ;;  %v2703_v4 = vld [vmem:[%s2951_s3 + $0x8] sm:$0xff]  ;;  %v1490_v1 = vld [vmem:[%s2923_s11 + $0x10] sm:$0xff] }
 0x3c1   :  { %v928_v10 = vmul.f32 %v2590_v38, %v927_v55  ;;  %vm931_vm10 = vweird.f32 %v2590_v38  ;;  %v965_v22 = vor.u32 1.1754944e-38, %v964_v14  ;;  %vm963_vm12 = vcmp.eq.f32.partialorder %v962_v49, 8.507059e+37  ;;  %v1796_v55 = vld [vmem:[%s2922_s10] ss:$0 sm:$0xff] }
 0x3c2   :  { %v943_v16 = vadd.f32 %v2582_v35, %v942_v5  ;;  %v914_v63 = vmul.f32 %v2602_v33, %v913_v40  ;;  %v936_v48 = vand.u32 2147483648, %v2506_v28  ;;  %v951_v52 = vor.u32 1.1754944e-38, %v950_v58  ;;  %vm2670_vm14 = vmor %vm930_vm13, %vm931_vm10  ;;  %v1237_v5 = vld [vmem:[#allocation2 + $0x10] sm:$0xff]  ;;  %v1236_v40 = vld [vmem:[#allocation2 + $0x8] sm:$0xff] }
 0x3c3   :  { %v1866_v36 = vpop.eup %1865  ;;  %v929_v61 = vadd.f32 %v2590_v38, %v928_v10  ;;  %v934_v31 = vand.u32 2147483647, %v2506_v28  ;;  %vm949_vm15 = vcmp.eq.f32.partialorder %v948_v6, 8.507059e+37  ;;  %vm917_vm1 = vweird.f32 %v2602_v33  ;;  %v1235_v10 = vld [vmem:[#allocation2] sm:$0xff] }
 0x3c4   :  { %v954_v39 = vmul.f32 %v1866_v36, %v2595_v50  ;;  %1764 = vmatpush.xpose.msk.msrb.mxu0 %vm154_vm0, %v1093_v0  ;;  %vm959_vm8 = vweird.f32 %v1866_v36  ;;  %v947_v11 = vsel %vm2650_vm4, %v2582_v35, %v943_v16  ;;  %v915_v25 = vadd.f32 %v2602_v33, %v914_v63  ;;  %v1493_v0 = vld [vmem:[%s2923_s11 + $0x28] sm:$0xff] }
 0x3c5   :  { %vm960_vm11 = vmor %vm958_vm6, %vm959_vm8  ;;  %v952_v35 = vsel %vm949_vm15, %v951_v52, %v947_v11  ;;  %v933_v28 = vsel %vm2670_vm14, %v2590_v38, %v929_v61  ;;  %v937_v56 = vor.u32 1.1754944e-38, %v936_v48  ;;  %vm916_vm2 = vweird.f32 %v2393_v34  ;;  %v411_v38 = vpop.f32.mrf.mxu2  ;;  %1523 = vmatpush.msra.mxu1 %v1493_v0 }
 0x3c6   :  { %v955_v12 = vsub.f32 1.0, %v954_v39  ;;  %v920_v8 = vand.u32 2147483647, %v2393_v34  ;;  %vm935_vm3 = vcmp.eq.f32.partialorder %v934_v31, 8.507059e+37  ;;  %v1085_v43 = vmul.f32 %v2362_v17, %v952_v35  ;;  %vm918_vm5 = vmor %vm916_vm2, %vm917_vm1  ;;  %v329_v17 = vpop.permute.xlu2 %328 }
 0x3c7   :  { %v938_v47 = vsel %vm935_vm3, %v937_v56, %v933_v28  ;;  %v919_v54 = vsel %vm918_vm5, %v2602_v33, %v915_v25  ;;  %vm1500_vm8 = vcmask 523264   ;;  %v1798_v28 = vld [vmem:[%s2918_s6] ss:$0 sm:$0xff] }
 0x3c8   :  { %v956_v20 = vmul.f32 %v1866_v36, %v955_v12  ;;  %1765 = vmatpush.xpose.msk.msrb.mxu0 %vm154_vm0, %v1092_v53  ;;  %vm921_vm7 = vcmp.eq.f32.partialorder %v920_v8, 8.507059e+37  ;;  %v1084_v44 = vmul.f32 %v2352_v7, %v938_v47  ;;  %v406_v7 = vadd.f32 %v2626_v30, %v329_v17  ;;  %v1488_v53 = vld [vmem:[%s2923_s11] sm:$0xff] }
 0x3ca   :  { %v957_v41 = vadd.f32 %v1866_v36, %v956_v20 }
 0x3cc   :  { %v961_v46 = vsel %vm960_vm11, %v1866_v36, %v957_v41  ;;  %1766 = vmatpush.xpose.msk.msrb.mxu0 %vm154_vm0, %v1091_v21  ;;  %v1492_v36 = vld [vmem:[%s2923_s11 + $0x20] sm:$0xff]  ;;  %s1673_s11 = sshll.u32 %s2928_s16, 4  ;;  %s1674_s11 = int_to_ptr.hbm [resolvable:$true] %s1673_s11 }
 0x3cd   :  { %v966_v24 = vsel %vm963_vm12, %v965_v22, %v961_v46  ;;  %1524 = vmatpush.msra.mxu1 %v1492_v36  ;;  %v1797_v22 = vld [vmem:[%s2924_s12] ss:$0 sm:$0xff] }
 0x3ce   :  { %v1086_v50 = vmul.f32 %v2369_v19, %v966_v24  ;;  %v922_v19 = vand.u32 2147483648, %v2393_v34 }
 0x3cf   :  { %v334_v9 = vpop.permute.xlu0 %333  ;;  %1525 = vmatpush.msra.mxu1 %v1491_v62 }
 0x3d0   :  { %v409_v23 = vadd.f32 %v408_v27, %v334_v9  ;;  %1753 = vmatpush.xpose.msk.msra.mxu2 %vm154_vm0, %v1086_v50  ;;  %v923_v45 = vor.u32 1.1754944e-38, %v922_v19 }
 0x3d1   :  { %1526 = vmatpush.msra.mxu1 %v1490_v1 }
 0x3d2   :  { %1762 = vmatmul.msk.f32.vlgmr.msra.gmra.mxu3 %vm154_vm0, %v409_v23  ;;  %v924_v13 = vsel %vm921_vm7, %v923_v45, %v919_v54 }
 0x3d3   :  { %v1083_v33 = vmul.f32 %v2323_v42, %v924_v13  ;;  %v2718_v42 = vld [vmem:[%s2951_s3 + $0x18] sm:$0xff]  ;;  %1527 = vmatpush.msra.mxu1 %v1489_v37  ;;  %s1658_s3 = sshll.u32 %s1999_s18, 4  ;;  %s1659_s3 = int_to_ptr.vmem [resolvable:$true] %s1658_s3 }
 0x3d4   :  { %1754 = vmatpush.xpose.msk.msra.mxu2 %vm154_vm0, %v1085_v43  ;;  %v1998_v43 = vmov 32.0  }
 0x3d5   :  { %1528 = vmatpush.msra.mxu1 %v1488_v53  ;;  %1867 = vrcp.f32 %v1998_v43 }
 0x3d7   :  { %v339_v59 = vpop.permute.xlu0 %338 }
 0x3d8   :  { %v412_v34 = vadd.f32 %v411_v38, %v339_v59  ;;  %1755 = vmatpush.xpose.msk.msra.mxu2 %vm154_vm0, %v1084_v44 }
 0x3da   :  { %1767 = vmatmul.msk.f32.vlgmr.msrb.gmra.mxu0 %vm154_vm0, %v412_v34  ;;  %1772 = vmatmul.msk.f32.vlgmr.msrb.gmra.mxu3 %vm154_vm0, %v2691_v51 }
 0x3db   :  { %v1868_v54 = vpop.eup %1867 }
 0x3dc   :  { %1756 = vmatpush.xpose.msk.msra.mxu2 %vm154_vm0, %v1083_v33  ;;  %v1331_v59 = vmul.f32 32.0, %v1868_v54  ;;  %vm1335_vm9 = vweird.f32 %v1868_v54 }
 0x3de   :  { %v1332_v34 = vsub.f32 1.0, %v1331_v59 }
 0x3df   :  { %1757 = vmatmul.msk.f32.vlgmr.msra.gmra.mxu2 %vm154_vm0, %v406_v7 }
 0x3e0   :  { %1299 = vmatpush.msrb.mxu2 %v1238_v26  ;;  %v1333_v33 = vmul.f32 %v1868_v54, %v1332_v34  ;;  %v2828_v34 = vld [vmem:[%s2925_s13] ss:$0 sm:$0xff] }
 0x3e2   :  { %1773 = vmatmul.msk.f32.gmra.mxu3 %vm154_vm0, %v2703_v4  ;;  %1300 = vmatpush.msrb.mxu2 %v1237_v5 }
 0x3e4   :  { %1301 = vmatpush.msrb.mxu2 %v1236_v40 }
 0x3e6   :  { %1302 = vmatpush.msrb.mxu2 %v1235_v10 }
 0x3ea   :  { %1774 = vmatmul.msk.f32.gmra.mxu3 %vm154_vm0, %v2711_v3 }
 0x3f2   :  { %1775 = vmatmul.msk.f32.gmra.mxu3 %vm154_vm0, %v2718_v42 }
 0x43a   :  { %v1127_v29 = vpop.f32.mrf.mxu2 }
 0x43b   :  { %1243 = vxpose.xlu2.b32.start [1/4] (short) (narrow) %v1127_v29, 32  ;;  %v1334_v29 = vadd.f32 %v1868_v54, %v1333_v33 }
 0x43d   :  { %v2775_v0 = vsel %vm1335_vm9, %v1868_v54, %v1334_v29 }
 0x455   :  { %v1197_v30 = vpop.f32.mrf.mxu3 }
 0x457   :  { %v1232_v6 = vpop.f32.mrf.mxu0 }
 0x45d   :  { %v1472_v39 = vpop.f32.mrf.mxu3 }
 0x45e   :  { %v1473_v2 = vadd.f32 %v1796_v55, %v1472_v39 }
 0x460   :  { %v1484_v12 = vmax.f32 %v1473_v2, 0.0 }
 0x462   :  { %v1162_v14 = vpop.f32.mrf.mxu2  ;;  %1776 = vmatmul.msk.f32.vlgmr.msra.gmra.mxu1 %vm1500_vm8, %v1484_v12 }
 0x463   :  { %1244 = vxpose.xlu2.b32.cont [2/4] (short) (narrow) %v1162_v14, 32 }
 0x465   :  { %v1475_v57 = vpop.f32.mrf.mxu3 }
 0x466   :  { %v1476_v16 = vadd.f32 %v1796_v55, %v1475_v57 }
 0x468   :  { %v1485_v20 = vmax.f32 %v1476_v16, 0.0 }
 0x46a   :  { %1777 = vmatmul.msk.f32.gmra.mxu1 %vm1500_vm8, %v1485_v20 }
 0x46b   :  { %1245 = vxpose.xlu2.b32.cont [3/4] (short) (narrow) %v1197_v30, 32 }
 0x46d   :  { %v1478_v49 = vpop.f32.mrf.mxu3 }
 0x46e   :  { %v1479_v58 = vadd.f32 %v1796_v55, %v1478_v49 }
 0x470   :  { %v1486_v60 = vmax.f32 %v1479_v58, 0.0 }
 0x472   :  { %1778 = vmatmul.msk.f32.gmra.mxu1 %vm1500_vm8, %v1486_v60 }
 0x473   :  { %1246 = vxpose.xlu2.b32.end [4/4] (short) (narrow) %v1232_v6, 32 }
 0x475   :  { %v1481_v41 = vpop.f32.mrf.mxu3 }
 0x476   :  { %v1482_v21 = vadd.f32 %v1796_v55, %v1481_v41 }
 0x478   :  { %v1487_v63 = vmax.f32 %v1482_v21, 0.0 }
 0x47a   :  { %1779 = vmatmul.msk.f32.gmra.mxu1 %vm1500_vm8, %v1487_v63 }
 0x4df   :  { %v1530_v27 = vpop.f32.mrf.mxu1 }
 0x4e0   :  { %v1531_v61 = vadd.f32 %v1797_v22, %v1530_v27 }
 0x4e2   :  { %v1544_v46 = vsel %vm154_vm0, %v1531_v61, 0.0 }
 0x4e3   :  { %1545 = vadd.xlane.f32.xlu1 %v1544_v46 }
 0x4e7   :  { %v1533_v48 = vpop.f32.mrf.mxu1 }
 0x4e8   :  { %v2758_v52 = vadd.f32 %v1797_v22, %v1533_v48 }
 0x4ea   :  { %v1547_v55 = vsel %vm154_vm0, %v2758_v52, 0.0 }
 0x4ef   :  { %v1536_v31 = vpop.f32.mrf.mxu1 }
 0x4f0   :  { %v1537_v9 = vadd.f32 %v1797_v22, %v1536_v31 }
 0x4f2   :  { %v1550_v32 = vsel %vm154_vm0, %v1537_v9, 0.0 }
 0x4f4   :  { %v1259_v11 = vpop.trf.xlu2 }
 0x4f5   :  { %1768 = vmatmul.msk.f32.vlgmr.msrb.gmra.mxu2 %vm154_vm0, %v1259_v11 }
 0x4f7   :  { %v1539_v18 = vpop.f32.mrf.mxu1 }
 0x4f8   :  { %v2762_v23 = vadd.f32 %v1797_v22, %v1539_v18 }
 0x4fa   :  { %v1553_v35 = vsel %vm154_vm0, %v2762_v23, 0.0 }
 0x4fb   :  { %1554 = vadd.xlane.f32.xlu2 %v1553_v35 }
 0x4fc   :  { %v1260_v24 = vpop.trf.xlu2 }
 0x4fd   :  { %1769 = vmatmul.msk.f32.gmra.mxu2 %vm154_vm0, %v1260_v24 }
 0x504   :  { %v1261_v50 = vpop.trf.xlu2 }
 0x505   :  { %1770 = vmatmul.msk.f32.gmra.mxu2 %vm154_vm0, %v1261_v50 }
 0x50c   :  { %v1262_v25 = vpop.trf.xlu2 }
 0x50d   :  { %1771 = vmatmul.msk.f32.gmra.mxu2 %vm154_vm0, %v1262_v25 }
 0x556   :  { %v1546_v36 = vpop.xlane.xlu1 %1545 }
 0x557   :  { %v1556_v62 = vmul.f32 %v1546_v36, %v2775_v0 }
 0x559   :  { %v1560_v1 = vsub.f32 %v1531_v61, %v1556_v62 }
 0x55b   :  { %v1564_v26 = vmul.f32 %v1560_v1, %v1560_v1 }
 0x55d   :  { %v1568_v5 = vsel %vm154_vm0, %v1564_v26, 0.0 }
 0x56e   :  { %v1555_v25 = vpop.xlane.xlu2 %1554 }
 0x578   :  { %v1304_v19 = vpop.f32.mrf.mxu2 }
 0x579   :  { %v1305_v56 = vadd.f32 %v1798_v28, %v1304_v19  ;;  %v1559_v19 = vmul.f32 %v1555_v25, %v2775_v0 }
 0x57b   :  { %v1318_v8 = vsel %vm154_vm0, %v1305_v56, 0.0 }
 0x57c   :  { %1319 = vadd.xlane.f32.xlu1 %v1318_v8 }
 0x580   :  { %v1307_v47 = vpop.f32.mrf.mxu2 }
 0x581   :  { %v1308_v45 = vadd.f32 %v1798_v28, %v1307_v47  ;;  %v2820_v47 = vsub.f32 %v2762_v23, %v1559_v19  ;;  %v2833_v23 = vld [vmem:[%s2926_s14] ss:$0 sm:$0xff] }
 0x583   :  { %v1321_v38 = vsel %vm154_vm0, %v1308_v45, 0.0  ;;  %v1567_v59 = vmul.f32 %v2820_v47, %v2820_v47 }
 0x584   :  { %1322 = vadd.xlane.f32.xlu0 %v1321_v38 }
 0x585   :  { %v1577_v33 = vsel %vm154_vm0, %v1567_v59, 0.0 }
 0x588   :  { %v1310_v44 = vpop.f32.mrf.mxu2 }
 0x589   :  { %v1311_v13 = vadd.f32 %v1798_v28, %v1310_v44 }
 0x58b   :  { %v1324_v17 = vsel %vm154_vm0, %v1311_v13, 0.0 }
 0x58c   :  { %1325 = vadd.xlane.f32.xlu1 %v1324_v17 }
 0x590   :  { %v1313_v7 = vpop.f32.mrf.mxu2 }
 0x591   :  { %v1314_v15 = vadd.f32 %v1798_v28, %v1313_v7 }
 0x593   :  { %v1327_v30 = vsel %vm154_vm0, %v1314_v15, 0.0 }
 0x594   :  { %1328 = vadd.xlane.f32.xlu0 %v1327_v30  ;;  %1551 = vadd.xlane.f32.xlu1 %v1550_v32 }
 0x59c   :  { %1548 = vadd.xlane.f32.xlu0 %v1547_v55 }
 0x5a4   :  { %1569 = vadd.xlane.f32.xlu0 %v1568_v5 }
 0x5ef   :  { %v1320_v39 = vpop.xlane.xlu1 %1319 }
 0x5f0   :  { %v1337_v2 = vmul.f32 %v2775_v0, %v1320_v39 }
 0x5f2   :  { %v2782_v37 = vsub.f32 %v1305_v56, %v1337_v2 }
 0x5f4   :  { %v1345_v40 = vmul.f32 %v2782_v37, %v2782_v37 }
 0x5f6   :  { %v1349_v12 = vsel %vm154_vm0, %v1345_v40, 0.0 }
 0x5f7   :  { %1350 = vadd.xlane.f32.xlu0 %v1349_v12  ;;  %v1323_v53 = vpop.xlane.xlu0 %1322 }
 0x5f8   :  { %v1338_v27 = vmul.f32 %v2775_v0, %v1323_v53 }
 0x5fa   :  { %v2806_v11 = vsub.f32 %v1308_v45, %v1338_v27 }
 0x5fc   :  { %v1346_v18 = vmul.f32 %v2806_v11, %v2806_v11 }
 0x5fe   :  { %v1352_v35 = vsel %vm154_vm0, %v1346_v18, 0.0 }
 0x5ff   :  { %v1326_v10 = vpop.xlane.xlu1 %1325 }
 0x600   :  { %v1339_v14 = vmul.f32 %v2775_v0, %v1326_v10  ;;  %v2847_v10 = vld [vmem:[%s2919_s7] ss:$0 sm:$0xff] }
 0x602   :  { %v2788_v57 = vsub.f32 %v1311_v13, %v1339_v14 }
 0x604   :  { %v1347_v16 = vmul.f32 %v2788_v57, %v2788_v57 }
 0x606   :  { %v1355_v20 = vsel %vm154_vm0, %v1347_v16, 0.0  ;;  %v2852_v16 = vld [vmem:[%s2920_s8] ss:$0 sm:$0xff] }
 0x607   :  { %v1329_v49 = vpop.xlane.xlu0 %1328  ;;  %1356 = vadd.xlane.f32.xlu0 %v1355_v20  ;;  %v1552_v58 = vpop.xlane.xlu1 %1551 }
 0x608   :  { %v1558_v60 = vmul.f32 %v1552_v58, %v2775_v0 }
 0x60a   :  { %v2794_v6 = vsub.f32 %v1537_v9, %v1558_v60  ;;  %v1340_v9 = vmul.f32 %v2775_v0, %v1329_v49 }
 0x60c   :  { %v1566_v41 = vmul.f32 %v2794_v6, %v2794_v6 }
 0x60e   :  { %v1574_v21 = vsel %vm154_vm0, %v1566_v41, 0.0 }
 0x60f   :  { %v1549_v63 = vpop.xlane.xlu0 %1548  ;;  %1575 = vadd.xlane.f32.xlu0 %v1574_v21 }
 0x610   :  { %v1557_v22 = vmul.f32 %v1549_v63, %v2775_v0 }
 0x612   :  { %v2802_v61 = vsub.f32 %v2758_v52, %v1557_v22  ;;  %v2813_v52 = vsub.f32 %v1314_v15, %v1340_v9  ;;  %v1885_v15 = vld [vmem:[%s2913_s1] sm:$0xff] }
 0x614   :  { %v1565_v46 = vmul.f32 %v2802_v61, %v2802_v61  ;;  %v1348_v56 = vmul.f32 %v2813_v52, %v2813_v52 }
 0x616   :  { %v1571_v48 = vsel %vm154_vm0, %v1565_v46, 0.0  ;;  %v1358_v54 = vsel %vm154_vm0, %v1348_v56, 0.0 }
 0x617   :  { %1572 = vadd.xlane.f32.xlu1 %v1571_v48  ;;  %v1570_v24 = vpop.xlane.xlu0 %1569 }
 0x618   :  { %v1580_v31 = vmul.f32 %v1570_v24, %v2775_v0 }
 0x61a   :  { %v1584_v50 = vadd.f32 1e-05, %v1580_v31 }
 0x61c   :  { %1869 = vrsqrt.f32 %v1584_v50  ;;  %vm1594_vm6 = vweird.f32 %v1584_v50 }
 0x61f   :  { %1353 = vadd.xlane.f32.xlu1 %v1352_v35 }
 0x622   :  { %v1870_v28 = vpop.eup %1869 }
 0x623   :  { %v1589_v8 = vmul.f32 %v1870_v28, %v1584_v50  ;;  %vm1595_vm4 = vweird.f32 %v1870_v28 }
 0x624   :  { %vm1596_vm10 = vmor %vm1594_vm6, %vm1595_vm4 }
 0x625   :  { %v1590_v43 = vmul.f32 %v1870_v28, %v1589_v8 }
 0x627   :  { %v1591_v45 = vmul.f32 0.5, %v1590_v43  ;;  %1359 = vadd.xlane.f32.xlu1 %v1358_v54 }
 0x629   :  { %v1592_v38 = vsub.f32 1.5, %v1591_v45 }
 0x62b   :  { %v1593_v44 = vmul.f32 %v1870_v28, %v1592_v38 }
 0x62d   :  { %v1597_v13 = vsel %vm1596_vm10, %v1870_v28, %v1593_v44 }
 0x62e   :  { %v1628_v17 = vmul.f32 %v1597_v13, %v1560_v1 }
 0x62f   :  { %1578 = vadd.xlane.f32.xlu1 %v1577_v33 }
 0x630   :  { %v1635_v7 = vmul.f32 %v2828_v34, %v1628_v17 }
 0x632   :  { %v1642_v29 = vadd.f32 %v2833_v23, %v1635_v7 }
 0x634   :  { %v1646_v32 = vadd.f32 %v1885_v15, %v1642_v29 }
 0x636   :  { %1650 = vst.msk [vmem:[#allocation8] sm:$0xff] %vm154_vm0, %v1646_v32 }
 0x66a   :  { %v1351_v30 = vpop.xlane.xlu0 %1350 }
 0x66b   :  { %v1361_v36 = vmul.f32 %v1351_v30, %v2775_v0 }
 0x66d   :  { %v1365_v62 = vadd.f32 1e-05, %v1361_v36 }
 0x66f   :  { %1871 = vrsqrt.f32 %v1365_v62  ;;  %vm1375_vm12 = vweird.f32 %v1365_v62 }
 0x675   :  { %v1872_v55 = vpop.eup %1871 }
 0x676   :  { %v1370_v1 = vmul.f32 %v1872_v55, %v1365_v62  ;;  %vm1376_vm11 = vweird.f32 %v1872_v55 }
 0x677   :  { %vm1377_vm13 = vmor %vm1375_vm12, %vm1376_vm11 }
 0x678   :  { %v1371_v26 = vmul.f32 %v1872_v55, %v1370_v1 }
 0x67a   :  { %v1372_v5 = vmul.f32 0.5, %v1371_v26  ;;  %v1357_v39 = vpop.xlane.xlu0 %1356 }
 0x67b   :  { %v1363_v2 = vmul.f32 %v1357_v39, %v2775_v0 }
 0x67c   :  { %v1373_v40 = vsub.f32 1.5, %v1372_v5  ;;  %v1886_v5 = vld [vmem:[%s2913_s1 + $0x10] sm:$0xff] }
 0x67d   :  { %v1367_v12 = vadd.f32 1e-05, %v1363_v2 }
 0x67e   :  { %v1374_v53 = vmul.f32 %v1872_v55, %v1373_v40 }
 0x67f   :  { %1873 = vrsqrt.f32 %v1367_v12  ;;  %vm1395_vm14 = vweird.f32 %v1367_v12 }
 0x680   :  { %v1378_v14 = vsel %vm1377_vm13, %v1872_v55, %v1374_v53 }
 0x681   :  { %v1409_v20 = vmul.f32 %v1378_v14, %v2782_v37 }
 0x682   :  { %v1576_v49 = vpop.xlane.xlu0 %1575 }
 0x683   :  { %v1416_v58 = vmul.f32 %v2847_v10, %v1409_v20  ;;  %v1582_v60 = vmul.f32 %v1576_v49, %v2775_v0 }
 0x685   :  { %v1874_v41 = vpop.eup %1873  ;;  %v1423_v21 = vadd.f32 %v2852_v16, %v1416_v58  ;;  %v1586_v63 = vadd.f32 1e-05, %v1582_v60 }
 0x686   :  { %v1390_v22 = vmul.f32 %v1874_v41, %v1367_v12  ;;  %vm1396_vm15 = vweird.f32 %v1874_v41 }
 0x687   :  { %v1427_v27 = vadd.f32 %v1423_v21, %v2691_v51  ;;  %1875 = vrsqrt.f32 %v1586_v63  ;;  %vm1397_vm1 = vmor %vm1395_vm14, %vm1396_vm15  ;;  %vm1614_vm3 = vweird.f32 %v1586_v63 }
 0x688   :  { %v1391_v46 = vmul.f32 %v1874_v41, %v1390_v22  ;;  %v1887_v22 = vld [vmem:[%s2913_s1 + $0x8] sm:$0xff] }
 0x689   :  { %1431 = vst.msk [vmem:[#allocation7] sm:$0xff] %vm154_vm0, %v1427_v27 }
 0x68a   :  { %v1392_v48 = vmul.f32 0.5, %v1391_v46  ;;  %v1573_v24 = vpop.xlane.xlu1 %1572 }
 0x68b   :  { %v1581_v37 = vmul.f32 %v1573_v24, %v2775_v0 }
 0x68c   :  { %v1393_v31 = vsub.f32 1.5, %v1392_v48 }
 0x68d   :  { %v1876_v9 = vpop.eup %1875  ;;  %v1585_v50 = vadd.f32 1e-05, %v1581_v37 }
 0x68e   :  { %v1394_v18 = vmul.f32 %v1874_v41, %v1393_v31  ;;  %v1609_v35 = vmul.f32 %v1876_v9, %v1586_v63  ;;  %vm1615_vm2 = vweird.f32 %v1876_v9 }
 0x68f   :  { %1877 = vrsqrt.f32 %v1585_v50  ;;  %vm1616_vm5 = vmor %vm1614_vm3, %vm1615_vm2  ;;  %vm1604_vm8 = vweird.f32 %v1585_v50 }
 0x690   :  { %v1398_v25 = vsel %vm1397_vm1, %v1874_v41, %v1394_v18  ;;  %v1610_v28 = vmul.f32 %v1876_v9, %v1609_v35 }
 0x691   :  { %v1411_v51 = vmul.f32 %v1398_v25, %v2788_v57 }
 0x692   :  { %v1611_v19 = vmul.f32 0.5, %v1610_v28  ;;  %v1354_v56 = vpop.xlane.xlu1 %1353 }
 0x693   :  { %v1418_v8 = vmul.f32 %v2847_v10, %v1411_v51  ;;  %v1362_v43 = vmul.f32 %v1354_v56, %v2775_v0 }
 0x694   :  { %v1612_v54 = vsub.f32 1.5, %v1611_v19 }
 0x695   :  { %v1878_v45 = vpop.eup %1877  ;;  %v1425_v38 = vadd.f32 %v2852_v16, %v1418_v8  ;;  %v1366_v59 = vadd.f32 1e-05, %v1362_v43 }
 0x696   :  { %v1613_v44 = vmul.f32 %v1876_v9, %v1612_v54  ;;  %v1599_v13 = vmul.f32 %v1878_v45, %v1585_v50  ;;  %vm1605_vm7 = vweird.f32 %v1878_v45 }
 0x697   :  { %v1429_v17 = vadd.f32 %v1425_v38, %v2711_v3  ;;  %1879 = vrsqrt.f32 %v1366_v59  ;;  %vm1606_vm9 = vmor %vm1604_vm8, %vm1605_vm7  ;;  %vm1385_vm6 = vweird.f32 %v1366_v59 }
 0x698   :  { %v1617_v57 = vsel %vm1616_vm5, %v1876_v9, %v1613_v44  ;;  %v1600_v33 = vmul.f32 %v1878_v45, %v1599_v13 }
 0x699   :  { %1433 = vst.msk [vmem:[#allocation7 + $0x10] sm:$0xff] %vm154_vm0, %v1429_v17  ;;  %v1630_v7 = vmul.f32 %v1617_v57, %v2794_v6 }
 0x69a   :  { %v1601_v29 = vmul.f32 0.5, %v1600_v33  ;;  %v1360_v15 = vpop.xlane.xlu1 %1359 }
 0x69b   :  { %v1637_v32 = vmul.f32 %v2828_v34, %v1630_v7  ;;  %v1364_v30 = vmul.f32 %v1360_v15, %v2775_v0 }
 0x69c   :  { %v1602_v36 = vsub.f32 1.5, %v1601_v29 }
 0x69d   :  { %v1880_v62 = vpop.eup %1879  ;;  %v1644_v55 = vadd.f32 %v2833_v23, %v1637_v32  ;;  %v1368_v3 = vadd.f32 1e-05, %v1364_v30 }
 0x69e   :  { %v1603_v1 = vmul.f32 %v1878_v45, %v1602_v36  ;;  %v1380_v26 = vmul.f32 %v1880_v62, %v1366_v59  ;;  %vm1386_vm4 = vweird.f32 %v1880_v62 }
 0x69f   :  { %v1648_v6 = vadd.f32 %v1886_v5, %v1644_v55  ;;  %1881 = vrsqrt.f32 %v1368_v3  ;;  %vm1387_vm10 = vmor %vm1385_vm6, %vm1386_vm4  ;;  %vm1405_vm12 = vweird.f32 %v1368_v3 }
 0x6a0   :  { %v1607_v39 = vsel %vm1606_vm9, %v1878_v45, %v1603_v1  ;;  %v1381_v2 = vmul.f32 %v1880_v62, %v1380_v26 }
 0x6a1   :  { %1652 = vst.msk [vmem:[#allocation8 + $0x10] sm:$0xff] %vm154_vm0, %v1648_v6  ;;  %v1629_v40 = vmul.f32 %v1607_v39, %v2802_v61 }
 0x6a2   :  { %v1382_v12 = vmul.f32 0.5, %v1381_v2  ;;  %v1579_v53 = vpop.xlane.xlu1 %1578 }
 0x6a3   :  { %v1636_v14 = vmul.f32 %v2828_v34, %v1629_v40  ;;  %v1583_v20 = vmul.f32 %v1579_v53, %v2775_v0 }
 0x6a4   :  { %v1383_v49 = vsub.f32 1.5, %v1382_v12 }
 0x6a5   :  { %v1882_v58 = vpop.eup %1881  ;;  %v1643_v60 = vadd.f32 %v2833_v23, %v1636_v14  ;;  %v1587_v41 = vadd.f32 1e-05, %v1583_v20 }
 0x6a6   :  { %v1384_v21 = vmul.f32 %v1880_v62, %v1383_v49  ;;  %v1400_v63 = vmul.f32 %v1882_v58, %v1368_v3  ;;  %vm1406_vm11 = vweird.f32 %v1882_v58 }
 0x6a7   :  { %v1647_v61 = vadd.f32 %v1887_v22, %v1643_v60  ;;  %1883 = vrsqrt.f32 %v1587_v41  ;;  %vm1407_vm13 = vmor %vm1405_vm12, %vm1406_vm11  ;;  %vm1624_vm14 = vweird.f32 %v1587_v41 }
 0x6a8   :  { %v1388_v27 = vsel %vm1387_vm10, %v1880_v62, %v1384_v21  ;;  %v1401_v46 = vmul.f32 %v1882_v58, %v1400_v63 }
 0x6a9   :  { %1651 = vst.msk [vmem:[#allocation8 + $0x8] sm:$0xff] %vm154_vm0, %v1647_v61  ;;  %v1410_v0 = vmul.f32 %v1388_v27, %v2806_v11 }
 0x6aa   :  { %v1402_v48 = vmul.f32 0.5, %v1401_v46 }
 0x6ab   :  { %v1417_v24 = vmul.f32 %v2847_v10, %v1410_v0 }
 0x6ac   :  { %v1403_v37 = vsub.f32 1.5, %v1402_v48 }
 0x6ad   :  { %v1884_v31 = vpop.eup %1883  ;;  %v1424_v9 = vadd.f32 %v2852_v16, %v1417_v24 }
 0x6ae   :  { %v1404_v50 = vmul.f32 %v1882_v58, %v1403_v37  ;;  %v1619_v18 = vmul.f32 %v1884_v31, %v1587_v41  ;;  %vm1625_vm15 = vweird.f32 %v1884_v31 }
 0x6af   :  { %v1428_v35 = vadd.f32 %v1424_v9, %v2703_v4  ;;  %vm1626_vm1 = vmor %vm1624_vm14, %vm1625_vm15 }
 0x6b0   :  { %v1408_v25 = vsel %vm1407_vm13, %v1882_v58, %v1404_v50  ;;  %v1620_v28 = vmul.f32 %v1884_v31, %v1619_v18 }
 0x6b1   :  { %1432 = vst.msk [vmem:[#allocation7 + $0x8] sm:$0xff] %vm154_vm0, %v1428_v35  ;;  %v1412_v11 = vmul.f32 %v1408_v25, %v2813_v52 }
 0x6b2   :  { %v1621_v51 = vmul.f32 0.5, %v1620_v28 }
 0x6b3   :  { %v1419_v19 = vmul.f32 %v2847_v10, %v1412_v11 }
 0x6b4   :  { %v1622_v56 = vsub.f32 1.5, %v1621_v51 }
 0x6b5   :  { %v1426_v4 = vadd.f32 %v2852_v16, %v1419_v19  ;;  %v1888_v16 = vld [vmem:[%s2913_s1 + $0x18] sm:$0xff] }
 0x6b6   :  { %v1623_v8 = vmul.f32 %v1884_v31, %v1622_v56 }
 0x6b7   :  { %v1430_v43 = vadd.f32 %v1426_v4, %v2718_v42 }
 0x6b8   :  { %v1627_v52 = vsel %vm1626_vm1, %v1884_v31, %v1623_v8 }
 0x6b9   :  { %1434 = vst.msk [vmem:[#allocation7 + $0x18] sm:$0xff] %vm154_vm0, %v1430_v43  ;;  %v1631_v10 = vmul.f32 %v1627_v52, %v2820_v47 }
 0x6ba   :  { %1666 = dma.vmem_to_hbm [thread:$0]  %s1659_s3, 512, %s1661_s21, [#allocation4], %s1994_s29, %s1994_s29, %s1995_s30  }
 0x6bb   :  { %v1638_v54 = vmul.f32 %v2828_v34, %v1631_v10 }
 0x6bd   :  { %v1645_v42 = vadd.f32 %v2833_v23, %v1638_v54 }
 0x6bf   :  { %v1649_v45 = vadd.f32 %v1888_v16, %v1645_v42 }
 0x6c1   :  { %1653 = vst.msk [vmem:[#allocation8 + $0x18] sm:$0xff] %vm154_vm0, %v1649_v45 }
 0x6c2   :  { %1679 = dma.vmem_to_hbm [thread:$0]  %s1672_s22, 512, %s1674_s11, [#allocation9], %s1994_s29, %s1994_s29, %s1995_s30  }
 0x6c3   :  { %1989 = dma.done.wait [#allocation4], 512  }
 0x6c4   :  { %1990 = vsyncadd [#allocation4], 4294966784 }
 0x6c5   :  { %1991 = dma.done.wait [#allocation9], 512  }
 0x6c6   :  { %1992 = vsyncadd [#allocation9], 4294966784 }
 0x6c7   :  { %1688 = vsyncpa [#allocation3], 1 }
 0x6c8   :  { %1689 = vsyncpa [#allocation6], 1 }
 0x6c9   :  { %1690 = vsyncpa [#allocation4], 1 }
 0x6ca   :  { %1691 = vsyncpa [#allocation9], 1 }

</bundles_post_ra>
